<compile_context>
chip_gen: v5e
topology: v5e:2x2
jax: 0.10.0
libtpu: 0.0.40
codegen_flags: <defaults>
</compile_context>

<pallas_src>
import functools

import jax
import jax.numpy as jnp
import numpy as np
from jax.experimental import pallas as pl
from jax.experimental.pallas import tpu as pltpu


# ----------------------------------------------------------------------------
# VMEM-budget helpers (review: make tiling / vmem_limit generation-aware)
# ----------------------------------------------------------------------------
def _tpu_vmem_capacity_bytes():
    """Physical VMEM per core; fall back to the smallest (v7x: 64 MiB)."""
    try:
        info = pltpu.get_tpu_info()
        cap = int(getattr(info, "vmem_capacity_bytes", 0))
        if cap > 0:
            return cap
    except Exception:
        pass
    return 64 * 1024 * 1024


_VMEM_CAP = _tpu_vmem_capacity_bytes()
_VMEM_LIMIT = int(0.75 * _VMEM_CAP)      # scoped limit handed to Mosaic
_TILE_BUDGET = int(0.45 * _VMEM_CAP)     # budget for live per-step tiles


def _pick_spatial_tile(hwp, bytes_per_spatial_elem, min_tiles=1):
    """Largest 128-multiple divisor of hwp whose live bytes fit the budget."""
    cap_elems = max(128, _TILE_BUDGET // max(bytes_per_spatial_elem, 1))
    cands = [d for d in range(128, hwp + 1, 128) if hwp % d == 0]
    ok = [d for d in cands if d <= cap_elems and hwp // d >= min_tiles]
    if ok:
        return max(ok)
    ok = [d for d in cands if d <= cap_elems]
    if ok:
        return max(ok)
    return min(cands) if cands else hwp


def _pick_channel_tile(c_, hwp, cout_b, act_itemsize):
    """C_ tile for the fused pool+cv2 kernel.

    Must be the full extent or a multiple of 128 (it is the lane dim of the
    cv2 weight block and the sublane dim of the x1 block, so 128 also covers
    bf16 sublane packing)."""
    fixed = 3 * cout_b * hwp * 4                       # f32 acc + 2x f32 out block
    per_c = 5 * hwp * act_itemsize + 8 * cout_b * 4    # 2x x1 + y1..y3 + weight cols
    cap = max(1, (_TILE_BUDGET - fixed) // max(per_c, 1))
    if c_ <= cap:
        return c_
    cands = [d for d in range(128, c_, 128) if c_ % d == 0 and d <= cap]
    return max(cands) if cands else c_


def _silu_eup(y):
    # SiLU with EUP-only transcendentals: exp and the approximate reciprocal
    # both issue on the EUP slot (no exact-divide Newton sequence on the VALU).
    return y * pl.reciprocal(1.0 + jnp.exp(-y), approx=True)


# ----------------------------------------------------------------------------
# Kernel 1: cv1 = pointwise (1x1) conv + folded BN + SiLU, channels-first.
#   x_ref: (1, Cin, t), w_ref: (Cout, Cin) f32, s/b: (Cout, 1) f32,
#   o_ref: (1, Cout, t)
# ----------------------------------------------------------------------------
def _conv1x1_bn_silu_kernel(x_ref, w_ref, s_ref, b_ref, o_ref):
    x = x_ref[0]                                       # (Cin, t), compute dtype
    w = w_ref[...].astype(x.dtype)                     # tiny; cast on-chip
    y = jnp.dot(w, x, preferred_element_type=jnp.float32)
    y = y * s_ref[...] + b_ref[...]                    # folded BatchNorm (eval)
    o_ref[0] = _silu_eup(y).astype(o_ref.dtype)


def conv1x1_bn_silu(x, w_t, scale, bias, *, out_dtype, min_spatial_tiles=1):
    """x: (N, Cin, HWp); w_t: (Cout, Cin) f32; scale/bias: (Cout,) -> (N, Cout, HWp)."""
    N, Cin, HWp = x.shape
    Cout = w_t.shape[0]
    bytes_per = 2 * (Cin * x.dtype.itemsize + Cout * jnp.dtype(out_dtype).itemsize)
    t = _pick_spatial_tile(HWp, bytes_per, min_tiles=min_spatial_tiles)
    s2 = scale.reshape(Cout, 1).astype(jnp.float32)
    b2 = bias.reshape(Cout, 1).astype(jnp.float32)
    return pl.pallas_call(
        _conv1x1_bn_silu_kernel,
        out_shape=jax.ShapeDtypeStruct((N, Cout, HWp), out_dtype),
        grid_spec=pltpu.PrefetchScalarGridSpec(
            num_scalar_prefetch=0,
            grid=(N, HWp // t),
            in_specs=[
                pl.BlockSpec((1, Cin, t), lambda n, j: (n, 0, j)),
                pl.BlockSpec((Cout, Cin), lambda n, j: (0, 0)),
                pl.BlockSpec((Cout, 1), lambda n, j: (0, 0)),
                pl.BlockSpec((Cout, 1), lambda n, j: (0, 0)),
            ],
            out_specs=pl.BlockSpec((1, Cout, t), lambda n, j: (n, 0, j)),
        ),
        compiler_params=pltpu.CompilerParams(
            dimension_semantics=("parallel", "parallel"),
            vmem_limit_bytes=_VMEM_LIMIT),
    )(x, w_t, s2, b2)


# ----------------------------------------------------------------------------
# Kernel 2: fused [three chained 5x5/s1/p2 max pools] + concat + cv2(+BN+SiLU).
#   y1/y2/y3 never touch HBM; cv2 accumulates into a resident f32 VMEM block.
#   Grid: (N, Cout-tiles, C_-tiles); the C_ axis is the reduction ("arbitrary").
# ----------------------------------------------------------------------------
def _pool3_cat_conv_kernel(mask_ref, x_ref, w0_ref, w1_ref, w2_ref, w3_ref,
                           s_ref, b_ref, o_ref, acc_ref, *, shifts):
    c = pl.program_id(2)

    @pl.when(c == 0)
    def _():
        acc_ref[...] = jnp.zeros_like(acc_ref)

    x = x_ref[0]                                       # (cb, HWp), compute dtype
    neg = jnp.array(-jnp.inf, dtype=x.dtype)
    # Static {1,0} border-validity masks, hoisted (reused by all 3 pools).
    valid = [mask_ref[i] > 0.5 for i in range(8)]      # each (1, HWp) bool

    def pool5(v):
        # Separable 5x5 max: 5-tap max along W, then 5-tap max along H.
        # Taps that cross a row / image border are replaced with -inf
        # (jnp.where, not "+ -inf bias", so +inf activations can't make NaN).
        yw = v
        for i in range(4):
            yw = jnp.maximum(
                yw, jnp.where(valid[i], pltpu.roll(v, shift=shifts[i], axis=1), neg))
        yh = yw
        for i in range(4, 8):
            yh = jnp.maximum(
                yh, jnp.where(valid[i], pltpu.roll(yw, shift=shifts[i], axis=1), neg))
        return yh

    y1 = pool5(x)
    y2 = pool5(y1)
    y3 = pool5(y2)

    cdt = x.dtype
    acc = jnp.dot(w0_ref[...].astype(cdt), x, preferred_element_type=jnp.float32)
    acc = acc + jnp.dot(w1_ref[...].astype(cdt), y1, preferred_element_type=jnp.float32)
    acc = acc + jnp.dot(w2_ref[...].astype(cdt), y2, preferred_element_type=jnp.float32)
    acc = acc + jnp.dot(w3_ref[...].astype(cdt), y3, preferred_element_type=jnp.float32)
    acc_ref[...] = acc_ref[...] + acc

    @pl.when(c == pl.num_programs(2) - 1)
    def _():
        y = acc_ref[...] * s_ref[...] + b_ref[...]     # folded BatchNorm (eval)
        o_ref[0] = _silu_eup(y).astype(o_ref.dtype)


def pool3_cat_conv1x1_bn_silu(x1, w_parts, scale, bias, H, W, *,
                              out_dtype=jnp.float32, cout_tiles=1):
    """x1: (N, C_, HWp); w_parts: 4 x (C2, C_) f32 for [x1, y1, y2, y3]."""
    N, C_, HWp = x1.shape
    C2 = w_parts[0].shape[0]
    assert C2 % cout_tiles == 0
    cout_b = C2 // cout_tiles
    cb = _pick_channel_tile(C_, HWp, cout_b, x1.dtype.itemsize)

    # Tap offsets in the flattened index; pltpu.roll(v, s)[i] = v[i - s], so
    # to read v[i + d] we roll by (-d) % HWp.
    tap_d = [-2, -1, 1, 2, -2 * W, -W, W, 2 * W]
    shifts = tuple((-d) % HWp for d in tap_d)

    # Per-tap validity at the destination index (covers pad lanes beyond H*W too).
    r = np.arange(HWp)
    col, row = r % W, r // W
    masks = []
    for d in (-2, -1, 1, 2):                           # W-direction taps
        masks.append((col + d >= 0) & (col + d < W))
    for d in (-2, -1, 1, 2):                           # H-direction taps
        masks.append((row + d >= 0) & (row + d < H))
    masks = jnp.asarray(np.stack(masks)[:, None, :].astype(np.float32))  # (8,1,HWp)

    s2 = scale.reshape(C2, 1).astype(jnp.float32)
    b2 = bias.reshape(C2, 1).astype(jnp.float32)

    m_spec = pl.BlockSpec((8, 1, HWp), lambda n, co, c: (0, 0, 0))
    x_spec = pl.BlockSpec((1, cb, HWp), lambda n, co, c: (n, c, 0))
    w_spec = pl.BlockSpec((cout_b, cb), lambda n, co, c: (co, c))
    v_spec = pl.BlockSpec((cout_b, 1), lambda n, co, c: (co, 0))
    o_spec = pl.BlockSpec((1, cout_b, HWp), lambda n, co, c: (n, co, 0))  # resident over c

    return pl.pallas_call(
        functools.partial(_pool3_cat_conv_kernel, shifts=shifts),
        out_shape=jax.ShapeDtypeStruct((N, C2, HWp), out_dtype),
        grid_spec=pltpu.PrefetchScalarGridSpec(
            num_scalar_prefetch=0,
            grid=(N, cout_tiles, C_ // cb),
            in_specs=[m_spec, x_spec] + [w_spec] * 4 + [v_spec, v_spec],
            out_specs=o_spec,
            scratch_shapes=[pltpu.VMEM((cout_b, HWp), jnp.float32)],
        ),
        compiler_params=pltpu.CompilerParams(
            dimension_semantics=("parallel", "parallel", "arbitrary"),
            vmem_limit_bytes=_VMEM_LIMIT),
    )(masks, x1, *w_parts, s2, b2)


# ----------------------------------------------------------------------------
# SPPF forward (glue in plain JAX; heavy math in the two Pallas kernels)
# ----------------------------------------------------------------------------
def _fold_bn(gamma, beta, mean, var, eps=1e-5):
    scale = gamma / jnp.sqrt(var + eps)
    return scale, beta - mean * scale


@functools.partial(jax.jit, static_argnames=("use_bf16",))
def sppf_forward(x_nchw, params, use_bf16=False):
    """SPPF: cv1 -> [3 chained 5x5 maxpools + concat + cv2] (one fused kernel)."""
    N, C1, H, W = x_nchw.shape
    C_ = params["w1"].shape[1]
    C2 = params["w2"].shape[1]
    HW = H * W
    HWp = -(-HW // 128) * 128              # pad flattened spatial axis to lane multiple

    cdt = jnp.bfloat16 if use_bf16 else jnp.float32    # activation / MXU-operand dtype

    s1, b1 = _fold_bn(params["bn1_g"], params["bn1_b"], params["bn1_m"], params["bn1_v"])
    s2, b2 = _fold_bn(params["bn2_g"], params["bn2_b"], params["bn2_m"], params["bn2_v"])

    xf = x_nchw.reshape(N, C1, HW).astype(cdt)
    if HWp != HW:
        xf = jnp.pad(xf, ((0, 0), (0, 0), (0, HWp - HW)))

    # v7x has 2 TensorCores: make sure "parallel" grid axes have >= 2 points
    # when N == 1 (spatial split for cv1, Cout split for the fused kernel).
    min_sp = 2 if (N == 1 and HWp >= 256) else 1
    cout_tiles = 2 if (N == 1 and C2 % 16 == 0) else 1

    w1t = params["w1"].T.astype(jnp.float32)                       # (C_, C1)
    x1 = conv1x1_bn_silu(xf, w1t, s1, b1, out_dtype=cdt,
                         min_spatial_tiles=min_sp)                 # (N, C_, HWp)

    w2t = params["w2"].T.astype(jnp.float32)                       # (C2, 4*C_)
    w_parts = [w2t[:, i * C_:(i + 1) * C_] for i in range(4)]      # [x1, y1, y2, y3]
    out = pool3_cat_conv1x1_bn_silu(x1, w_parts, s2, b2, H, W,
                                    out_dtype=jnp.float32,
                                    cout_tiles=cout_tiles)         # (N, C2, HWp)
    return out[:, :, :HW].reshape(N, C2, H, W)


# ----------------------------------------------------------------------------
# Pure-JAX reference (correctness check)
# ----------------------------------------------------------------------------
def _ref_sppf(x, params):
    def conv(x, w, gamma, beta, mean, var):
        scale, bias = _fold_bn(gamma, beta, mean, var)
        y = jnp.einsum("nchw,cd->ndhw", x, w, precision=jax.lax.Precision.HIGHEST)
        y = y * scale[None, :, None, None] + bias[None, :, None, None]
        return y * jax.nn.sigmoid(y)

    def mp(x):
        return jax.lax.reduce_window(
            x, -jnp.inf, jax.lax.max,
            window_dimensions=(1, 1, 5, 5), window_strides=(1, 1, 1, 1),
            padding=[(0, 0), (0, 0), (2, 2), (2, 2)])

    x1 = conv(x, params["w1"], params["bn1_g"], params["bn1_b"],
              params["bn1_m"], params["bn1_v"])
    y1 = mp(x1); y2 = mp(y1); y3 = mp(y2)
    cat = jnp.concatenate([x1, y1, y2, y3], axis=1)
    return conv(cat, params["w2"], params["bn2_g"], params["bn2_b"],
                params["bn2_m"], params["bn2_v"])


if __name__ == "__main__":
    def make_params(key, c1, c2):
        c_ = c1 // 2
        ks = jax.random.split(key, 10)
        return {
            # cv1: Conv2d(c1, c_, 1, bias=False) weight (c_, c1, 1, 1) stored as (c1, c_)
            "w1": jax.random.normal(ks[0], (c1, c_), jnp.float32) * 0.1,
            "bn1_g": jax.random.uniform(ks[1], (c_,), jnp.float32, 0.5, 1.5),
            "bn1_b": jax.random.normal(ks[2], (c_,), jnp.float32) * 0.1,
            "bn1_m": jax.random.normal(ks[3], (c_,), jnp.float32) * 0.1,
            "bn1_v": jax.random.uniform(ks[4], (c_,), jnp.float32, 0.5, 1.5),
            # cv2: Conv2d(4*c_, c2, 1, bias=False) stored as (4*c_, c2)
            "w2": jax.random.normal(ks[5], (4 * c_, c2), jnp.float32) * 0.1,
            "bn2_g": jax.random.uniform(ks[6], (c2,), jnp.float32, 0.5, 1.5),
            "bn2_b": jax.random.normal(ks[7], (c2,), jnp.float32) * 0.1,
            "bn2_m": jax.random.normal(ks[8], (c2,), jnp.float32) * 0.1,
            "bn2_v": jax.random.uniform(ks[9], (c2,), jnp.float32, 0.5, 1.5),
        }

    root = jax.random.PRNGKey(0)
    k1, k2, k3, k4 = jax.random.split(root, 4)

    # --- Test 1: f32 path, HW already a lane multiple (16x16), N=2 ----------
    N, C1, H, W, C2 = 2, 8, 16, 16, 8
    x = jax.random.normal(k1, (N, C1, H, W), jnp.float32)
    params = make_params(k2, C1, C2)
    out = jax.block_until_ready(sppf_forward(x, params, use_bf16=False))
    ref = jax.block_until_ready(_ref_sppf(x, params))
    assert out.shape == (N, C2, H, W), out.shape
    # Tolerance covers the EUP approximate reciprocal in the SiLU epilogue and
    # default (non-HIGHEST) MXU precision in the kernel.
    np.testing.assert_allclose(np.asarray(out), np.asarray(ref), rtol=1e-2, atol=5e-3)

    # --- Test 2: bf16 activations, padded lanes (20x20=400 -> 512), N=1 -----
    N, C1, H, W, C2 = 1, 16, 20, 20, 16
    x = jax.random.normal(k3, (N, C1, H, W), jnp.float32)
    params = make_params(k4, C1, C2)
    out = jax.block_until_ready(sppf_forward(x, params, use_bf16=True))
    ref = jax.block_until_ready(_ref_sppf(x, params))
    assert out.shape == (N, C2, H, W), out.shape
    np.testing.assert_allclose(np.asarray(out), np.asarray(ref), rtol=5e-2, atol=2e-2)

    print("KERNEL_OK")
</pallas_src>

<mosaic_0001>
module attributes {stable_mosaic.version = 11 : i64} {
  func.func @_conv1x1_bn_silu_kernel(%arg0: i32, %arg1: i32, %arg2: memref<1x8x256xf32, #tpu.memory_space<vmem>>, %arg3: memref<4x8xf32, #tpu.memory_space<vmem>>, %arg4: memref<4x1xf32, #tpu.memory_space<vmem>>, %arg5: memref<4x1xf32, #tpu.memory_space<vmem>>, %arg6: memref<1x4x256xf32, #tpu.memory_space<vmem>>) attributes {dimension_semantics = [#tpu.dimension_semantics<parallel>, #tpu.dimension_semantics<parallel>], iteration_bounds = array<i64: 2, 1>, scalar_prefetch = 0 : i64, scratch_operands = 0 : i64, tpu.core_type = #tpu.core_type<tc>, window_params = [{transform_indices = @transform_0, window_bounds = array<i64: 1, 8, 256>}, {pipeline_mode = #tpu.pipeline_mode<synchronous>, transform_indices = @transform_1, window_bounds = array<i64: 4, 8>}, {pipeline_mode = #tpu.pipeline_mode<synchronous>, transform_indices = @transform_2, window_bounds = array<i64: 4, 1>}, {pipeline_mode = #tpu.pipeline_mode<synchronous>, transform_indices = @transform_3, window_bounds = array<i64: 4, 1>}, {transform_indices = @transform_4, window_bounds = array<i64: 1, 4, 256>}]} {
    %c0 = arith.constant 0 : index
    %c0_0 = arith.constant 0 : index
    %c0_1 = arith.constant 0 : index
    %0 = vector.load %arg2[%c0, %c0_0, %c0_1] : memref<1x8x256xf32, #tpu.memory_space<vmem>>, vector<1x8x256xf32>
    %1 = vector.shape_cast %0 : vector<1x8x256xf32> to vector<8x256xf32>
    %c0_2 = arith.constant 0 : index
    %c0_3 = arith.constant 0 : index
    %2 = vector.load %arg3[%c0_2, %c0_3] : memref<4x8xf32, #tpu.memory_space<vmem>>, vector<4x8xf32>
    %cst = arith.constant dense<0.000000e+00> : vector<4x256xf32>
    %3 = tpu.matmul %2, %1, %cst {dimension_numbers = #tpu.dot_dimension_numbers<[1], [0], [0], [1], [0, 0, 1, 1], [], []>} : vector<4x8xf32>, vector<8x256xf32>, vector<4x256xf32> -> vector<4x256xf32>
    %c0_4 = arith.constant 0 : index
    %c0_5 = arith.constant 0 : index
    %4 = vector.load %arg4[%c0_4, %c0_5] : memref<4x1xf32, #tpu.memory_space<vmem>>, vector<4x1xf32>
    %5 = vector.broadcast %4 : vector<4x1xf32> to vector<4x256xf32>
    %6 = arith.mulf %3, %5 : vector<4x256xf32>
    %c0_6 = arith.constant 0 : index
    %c0_7 = arith.constant 0 : index
    %7 = vector.load %arg5[%c0_6, %c0_7] : memref<4x1xf32, #tpu.memory_space<vmem>>, vector<4x1xf32>
    %8 = vector.broadcast %7 : vector<4x1xf32> to vector<4x256xf32>
    %9 = arith.addf %6, %8 : vector<4x256xf32>
    %cst_8 = arith.constant 0.000000e+00 : f32
    %10 = vector.broadcast %cst_8 : f32 to vector<4x256xf32>
    %11 = arith.subf %10, %9 : vector<4x256xf32>
    %12 = math.exp %11 : vector<4x256xf32>
    %cst_9 = arith.constant 1.000000e+00 : f32
    %13 = vector.broadcast %cst_9 : f32 to vector<4x256xf32>
    %14 = arith.addf %13, %12 : vector<4x256xf32>
    %15 = tpu.reciprocal %14 {approx = true} : vector<4x256xf32> -> vector<4x256xf32>
    %16 = arith.mulf %9, %15 : vector<4x256xf32>
    %c0_10 = arith.constant 0 : index
    %c0_11 = arith.constant 0 : index
    %c0_12 = arith.constant 0 : index
    %17 = vector.load %arg6[%c0_10, %c0_11, %c0_12] : memref<1x4x256xf32, #tpu.memory_space<vmem>>, vector<1x4x256xf32>
    %18 = vector.shape_cast %17 : vector<1x4x256xf32> to vector<4x256xf32>
    %19 = vector.shape_cast %16 : vector<4x256xf32> to vector<1x4x256xf32>
    tpu.vector_store %arg6[%c0_10, %c0_11, %c0_12], %19 {strides = array<i32>} : memref<1x4x256xf32, #tpu.memory_space<vmem>>, vector<1x4x256xf32>,
    return
  }
  func.func @transform_0(%arg0: i32, %arg1: i32) -> (i32, i32, i32) {
    %c0_i32 = arith.constant 0 : i32
    %c0_i32_0 = arith.constant 0 : i32
    return %arg0, %c0_i32, %arg1 : i32, i32, i32
  }
  func.func @transform_1(%arg0: i32, %arg1: i32) -> (i32, i32) {
    %c0_i32 = arith.constant 0 : i32
    %c0_i32_0 = arith.constant 0 : i32
    %c0_i32_1 = arith.constant 0 : i32
    return %c0_i32, %c0_i32_0 : i32, i32
  }
  func.func @transform_2(%arg0: i32, %arg1: i32) -> (i32, i32) {
    %c0_i32 = arith.constant 0 : i32
    %c0_i32_0 = arith.constant 0 : i32
    %c0_i32_1 = arith.constant 0 : i32
    return %c0_i32, %c0_i32_0 : i32, i32
  }
  func.func @transform_3(%arg0: i32, %arg1: i32) -> (i32, i32) {
    %c0_i32 = arith.constant 0 : i32
    %c0_i32_0 = arith.constant 0 : i32
    %c0_i32_1 = arith.constant 0 : i32
    return %c0_i32, %c0_i32_0 : i32, i32
  }
  func.func @transform_4(%arg0: i32, %arg1: i32) -> (i32, i32, i32) {
    %c0_i32 = arith.constant 0 : i32
    %c0_i32_0 = arith.constant 0 : i32
    return %arg0, %c0_i32, %arg1 : i32, i32, i32
  }
}

module attributes {stable_mosaic.version = 11 : i64} {
  func.func @_pool3_cat_conv_kernel(%arg0: i32, %arg1: i32, %arg2: i32, %arg3: memref<8x1x256xf32, #tpu.memory_space<vmem>>, %arg4: memref<1x4x256xf32, #tpu.memory_space<vmem>>, %arg5: memref<8x4xf32, #tpu.memory_space<vmem>>, %arg6: memref<8x4xf32, #tpu.memory_space<vmem>>, %arg7: memref<8x4xf32, #tpu.memory_space<vmem>>, %arg8: memref<8x4xf32, #tpu.memory_space<vmem>>, %arg9: memref<8x1xf32, #tpu.memory_space<vmem>>, %arg10: memref<8x1xf32, #tpu.memory_space<vmem>>, %arg11: memref<1x8x256xf32, #tpu.memory_space<vmem>>, %arg12: memref<8x256xf32, #tpu.memory_space<vmem>>) attributes {dimension_semantics = [#tpu.dimension_semantics<parallel>, #tpu.dimension_semantics<parallel>, #tpu.dimension_semantics<arbitrary>], iteration_bounds = array<i64: 2, 1, 1>, scalar_prefetch = 0 : i64, scratch_operands = 1 : i64, tpu.core_type = #tpu.core_type<tc>, window_params = [{pipeline_mode = #tpu.pipeline_mode<synchronous>, transform_indices = @transform_0, window_bounds = array<i64: 8, 1, 256>}, {transform_indices = @transform_1, window_bounds = array<i64: 1, 4, 256>}, {transform_indices = @transform_2, window_bounds = array<i64: 8, 4>}, {transform_indices = @transform_3, window_bounds = array<i64: 8, 4>}, {transform_indices = @transform_4, window_bounds = array<i64: 8, 4>}, {transform_indices = @transform_5, window_bounds = array<i64: 8, 4>}, {transform_indices = @transform_6, window_bounds = array<i64: 8, 1>}, {transform_indices = @transform_7, window_bounds = array<i64: 8, 1>}, {transform_indices = @transform_8, window_bounds = array<i64: 1, 8, 256>}]} {
    %c0_i32 = arith.constant 0 : i32
    %0 = arith.cmpi eq, %arg2, %c0_i32 : i32
    %1 = arith.extui %0 : i1 to i32
    %c0_i32_0 = arith.constant 0 : i32
    %2 = arith.cmpi ne, %1, %c0_i32_0 : i32
    scf.if %2 {
      %cst_85 = arith.constant 0.000000e+00 : f32
      %198 = vector.broadcast %cst_85 : f32 to vector<8x256xf32>
      %c0_86 = arith.constant 0 : index
      %c0_87 = arith.constant 0 : index
      %199 = vector.load %arg12[%c0_86, %c0_87] : memref<8x256xf32, #tpu.memory_space<vmem>>, vector<8x256xf32>
      tpu.vector_store %arg12[%c0_86, %c0_87], %198 {strides = array<i32>} : memref<8x256xf32, #tpu.memory_space<vmem>>, vector<8x256xf32>,
    } else {
    }
    %c0 = arith.constant 0 : index
    %c0_1 = arith.constant 0 : index
    %c0_2 = arith.constant 0 : index
    %3 = vector.load %arg4[%c0, %c0_1, %c0_2] : memref<1x4x256xf32, #tpu.memory_space<vmem>>, vector<1x4x256xf32>
    %4 = vector.shape_cast %3 : vector<1x4x256xf32> to vector<4x256xf32>
    %c0_3 = arith.constant 0 : index
    %c0_4 = arith.constant 0 : index
    %c0_5 = arith.constant 0 : index
    %5 = vector.load %arg3[%c0_3, %c0_4, %c0_5] : memref<8x1x256xf32, #tpu.memory_space<vmem>>, vector<1x1x256xf32>
    %6 = vector.shape_cast %5 : vector<1x1x256xf32> to vector<1x256xf32>
    %cst = arith.constant 5.000000e-01 : f32
    %7 = vector.broadcast %cst : f32 to vector<1x256xf32>
    %8 = arith.cmpf ogt, %6, %7 : vector<1x256xf32>
    %c1 = arith.constant 1 : index
    %c0_6 = arith.constant 0 : index
    %c0_7 = arith.constant 0 : index
    %9 = vector.load %arg3[%c1, %c0_6, %c0_7] : memref<8x1x256xf32, #tpu.memory_space<vmem>>, vector<1x1x256xf32>
    %10 = vector.shape_cast %9 : vector<1x1x256xf32> to vector<1x256xf32>
    %cst_8 = arith.constant 5.000000e-01 : f32
    %11 = vector.broadcast %cst_8 : f32 to vector<1x256xf32>
    %12 = arith.cmpf ogt, %10, %11 : vector<1x256xf32>
    %c2 = arith.constant 2 : index
    %c0_9 = arith.constant 0 : index
    %c0_10 = arith.constant 0 : index
    %13 = vector.load %arg3[%c2, %c0_9, %c0_10] : memref<8x1x256xf32, #tpu.memory_space<vmem>>, vector<1x1x256xf32>
    %14 = vector.shape_cast %13 : vector<1x1x256xf32> to vector<1x256xf32>
    %cst_11 = arith.constant 5.000000e-01 : f32
    %15 = vector.broadcast %cst_11 : f32 to vector<1x256xf32>
    %16 = arith.cmpf ogt, %14, %15 : vector<1x256xf32>
    %c3 = arith.constant 3 : index
    %c0_12 = arith.constant 0 : index
    %c0_13 = arith.constant 0 : index
    %17 = vector.load %arg3[%c3, %c0_12, %c0_13] : memref<8x1x256xf32, #tpu.memory_space<vmem>>, vector<1x1x256xf32>
    %18 = vector.shape_cast %17 : vector<1x1x256xf32> to vector<1x256xf32>
    %cst_14 = arith.constant 5.000000e-01 : f32
    %19 = vector.broadcast %cst_14 : f32 to vector<1x256xf32>
    %20 = arith.cmpf ogt, %18, %19 : vector<1x256xf32>
    %c4 = arith.constant 4 : index
    %c0_15 = arith.constant 0 : index
    %c0_16 = arith.constant 0 : index
    %21 = vector.load %arg3[%c4, %c0_15, %c0_16] : memref<8x1x256xf32, #tpu.memory_space<vmem>>, vector<1x1x256xf32>
    %22 = vector.shape_cast %21 : vector<1x1x256xf32> to vector<1x256xf32>
    %cst_17 = arith.constant 5.000000e-01 : f32
    %23 = vector.broadcast %cst_17 : f32 to vector<1x256xf32>
    %24 = arith.cmpf ogt, %22, %23 : vector<1x256xf32>
    %c5 = arith.constant 5 : index
    %c0_18 = arith.constant 0 : index
    %c0_19 = arith.constant 0 : index
    %25 = vector.load %arg3[%c5, %c0_18, %c0_19] : memref<8x1x256xf32, #tpu.memory_space<vmem>>, vector<1x1x256xf32>
    %26 = vector.shape_cast %25 : vector<1x1x256xf32> to vector<1x256xf32>
    %cst_20 = arith.constant 5.000000e-01 : f32
    %27 = vector.broadcast %cst_20 : f32 to vector<1x256xf32>
    %28 = arith.cmpf ogt, %26, %27 : vector<1x256xf32>
    %c6 = arith.constant 6 : index
    %c0_21 = arith.constant 0 : index
    %c0_22 = arith.constant 0 : index
    %29 = vector.load %arg3[%c6, %c0_21, %c0_22] : memref<8x1x256xf32, #tpu.memory_space<vmem>>, vector<1x1x256xf32>
    %30 = vector.shape_cast %29 : vector<1x1x256xf32> to vector<1x256xf32>
    %cst_23 = arith.constant 5.000000e-01 : f32
    %31 = vector.broadcast %cst_23 : f32 to vector<1x256xf32>
    %32 = arith.cmpf ogt, %30, %31 : vector<1x256xf32>
    %c7 = arith.constant 7 : index
    %c0_24 = arith.constant 0 : index
    %c0_25 = arith.constant 0 : index
    %33 = vector.load %arg3[%c7, %c0_24, %c0_25] : memref<8x1x256xf32, #tpu.memory_space<vmem>>, vector<1x1x256xf32>
    %34 = vector.shape_cast %33 : vector<1x1x256xf32> to vector<1x256xf32>
    %cst_26 = arith.constant 5.000000e-01 : f32
    %35 = vector.broadcast %cst_26 : f32 to vector<1x256xf32>
    %36 = arith.cmpf ogt, %34, %35 : vector<1x256xf32>
    %c2_i32 = arith.constant 2 : i32
    %37 = tpu.dynamic_rotate %4 by %c2_i32 dim 1 : vector<4x256xf32>, i32 -> vector<4x256xf32>
    %cst_27 = arith.constant 0xFF800000 : f32
    %38 = vector.shape_cast %8 : vector<1x256xi1> to vector<1x256xi1>
    %39 = vector.broadcast %38 : vector<1x256xi1> to vector<4x256xi1>
    %40 = vector.broadcast %cst_27 : f32 to vector<4x256xf32>
    %41 = arith.select %39, %37, %40 : vector<4x256xi1>, vector<4x256xf32>
    %42 = arith.maximumf %4, %41 : vector<4x256xf32>
    %c1_i32 = arith.constant 1 : i32
    %43 = tpu.dynamic_rotate %4 by %c1_i32 dim 1 : vector<4x256xf32>, i32 -> vector<4x256xf32>
    %cst_28 = arith.constant 0xFF800000 : f32
    %44 = vector.shape_cast %12 : vector<1x256xi1> to vector<1x256xi1>
    %45 = vector.broadcast %44 : vector<1x256xi1> to vector<4x256xi1>
    %46 = vector.broadcast %cst_28 : f32 to vector<4x256xf32>
    %47 = arith.select %45, %43, %46 : vector<4x256xi1>, vector<4x256xf32>
    %48 = arith.maximumf %42, %47 : vector<4x256xf32>
    %c255_i32 = arith.constant 255 : i32
    %49 = tpu.dynamic_rotate %4 by %c255_i32 dim 1 : vector<4x256xf32>, i32 -> vector<4x256xf32>
    %cst_29 = arith.constant 0xFF800000 : f32
    %50 = vector.shape_cast %16 : vector<1x256xi1> to vector<1x256xi1>
    %51 = vector.broadcast %50 : vector<1x256xi1> to vector<4x256xi1>
    %52 = vector.broadcast %cst_29 : f32 to vector<4x256xf32>
    %53 = arith.select %51, %49, %52 : vector<4x256xi1>, vector<4x256xf32>
    %54 = arith.maximumf %48, %53 : vector<4x256xf32>
    %c254_i32 = arith.constant 254 : i32
    %55 = tpu.dynamic_rotate %4 by %c254_i32 dim 1 : vector<4x256xf32>, i32 -> vector<4x256xf32>
    %cst_30 = arith.constant 0xFF800000 : f32
    %56 = vector.shape_cast %20 : vector<1x256xi1> to vector<1x256xi1>
    %57 = vector.broadcast %56 : vector<1x256xi1> to vector<4x256xi1>
    %58 = vector.broadcast %cst_30 : f32 to vector<4x256xf32>
    %59 = arith.select %57, %55, %58 : vector<4x256xi1>, vector<4x256xf32>
    %60 = arith.maximumf %54, %59 : vector<4x256xf32>
    %c32_i32 = arith.constant 32 : i32
    %61 = tpu.dynamic_rotate %60 by %c32_i32 dim 1 : vector<4x256xf32>, i32 -> vector<4x256xf32>
    %cst_31 = arith.constant 0xFF800000 : f32
    %62 = vector.shape_cast %24 : vector<1x256xi1> to vector<1x256xi1>
    %63 = vector.broadcast %62 : vector<1x256xi1> to vector<4x256xi1>
    %64 = vector.broadcast %cst_31 : f32 to vector<4x256xf32>
    %65 = arith.select %63, %61, %64 : vector<4x256xi1>, vector<4x256xf32>
    %66 = arith.maximumf %60, %65 : vector<4x256xf32>
    %c16_i32 = arith.constant 16 : i32
    %67 = tpu.dynamic_rotate %60 by %c16_i32 dim 1 : vector<4x256xf32>, i32 -> vector<4x256xf32>
    %cst_32 = arith.constant 0xFF800000 : f32
    %68 = vector.shape_cast %28 : vector<1x256xi1> to vector<1x256xi1>
    %69 = vector.broadcast %68 : vector<1x256xi1> to vector<4x256xi1>
    %70 = vector.broadcast %cst_32 : f32 to vector<4x256xf32>
    %71 = arith.select %69, %67, %70 : vector<4x256xi1>, vector<4x256xf32>
    %72 = arith.maximumf %66, %71 : vector<4x256xf32>
    %c240_i32 = arith.constant 240 : i32
    %73 = tpu.dynamic_rotate %60 by %c240_i32 dim 1 : vector<4x256xf32>, i32 -> vector<4x256xf32>
    %cst_33 = arith.constant 0xFF800000 : f32
    %74 = vector.shape_cast %32 : vector<1x256xi1> to vector<1x256xi1>
    %75 = vector.broadcast %74 : vector<1x256xi1> to vector<4x256xi1>
    %76 = vector.broadcast %cst_33 : f32 to vector<4x256xf32>
    %77 = arith.select %75, %73, %76 : vector<4x256xi1>, vector<4x256xf32>
    %78 = arith.maximumf %72, %77 : vector<4x256xf32>
    %c224_i32 = arith.constant 224 : i32
    %79 = tpu.dynamic_rotate %60 by %c224_i32 dim 1 : vector<4x256xf32>, i32 -> vector<4x256xf32>
    %cst_34 = arith.constant 0xFF800000 : f32
    %80 = vector.shape_cast %36 : vector<1x256xi1> to vector<1x256xi1>
    %81 = vector.broadcast %80 : vector<1x256xi1> to vector<4x256xi1>
    %82 = vector.broadcast %cst_34 : f32 to vector<4x256xf32>
    %83 = arith.select %81, %79, %82 : vector<4x256xi1>, vector<4x256xf32>
    %84 = arith.maximumf %78, %83 : vector<4x256xf32>
    %c2_i32_35 = arith.constant 2 : i32
    %85 = tpu.dynamic_rotate %84 by %c2_i32_35 dim 1 : vector<4x256xf32>, i32 -> vector<4x256xf32>
    %cst_36 = arith.constant 0xFF800000 : f32
    %86 = vector.shape_cast %8 : vector<1x256xi1> to vector<1x256xi1>
    %87 = vector.broadcast %86 : vector<1x256xi1> to vector<4x256xi1>
    %88 = vector.broadcast %cst_36 : f32 to vector<4x256xf32>
    %89 = arith.select %87, %85, %88 : vector<4x256xi1>, vector<4x256xf32>
    %90 = arith.maximumf %84, %89 : vector<4x256xf32>
    %c1_i32_37 = arith.constant 1 : i32
    %91 = tpu.dynamic_rotate %84 by %c1_i32_37 dim 1 : vector<4x256xf32>, i32 -> vector<4x256xf32>
    %cst_38 = arith.constant 0xFF800000 : f32
    %92 = vector.shape_cast %12 : vector<1x256xi1> to vector<1x256xi1>
    %93 = vector.broadcast %92 : vector<1x256xi1> to vector<4x256xi1>
    %94 = vector.broadcast %cst_38 : f32 to vector<4x256xf32>
    %95 = arith.select %93, %91, %94 : vector<4x256xi1>, vector<4x256xf32>
    %96 = arith.maximumf %90, %95 : vector<4x256xf32>
    %c255_i32_39 = arith.constant 255 : i32
    %97 = tpu.dynamic_rotate %84 by %c255_i32_39 dim 1 : vector<4x256xf32>, i32 -> vector<4x256xf32>
    %cst_40 = arith.constant 0xFF800000 : f32
    %98 = vector.shape_cast %16 : vector<1x256xi1> to vector<1x256xi1>
    %99 = vector.broadcast %98 : vector<1x256xi1> to vector<4x256xi1>
    %100 = vector.broadcast %cst_40 : f32 to vector<4x256xf32>
    %101 = arith.select %99, %97, %100 : vector<4x256xi1>, vector<4x256xf32>
    %102 = arith.maximumf %96, %101 : vector<4x256xf32>
    %c254_i32_41 = arith.constant 254 : i32
    %103 = tpu.dynamic_rotate %84 by %c254_i32_41 dim 1 : vector<4x256xf32>, i32 -> vector<4x256xf32>
    %cst_42 = arith.constant 0xFF800000 : f32
    %104 = vector.shape_cast %20 : vector<1x256xi1> to vector<1x256xi1>
    %105 = vector.broadcast %104 : vector<1x256xi1> to vector<4x256xi1>
    %106 = vector.broadcast %cst_42 : f32 to vector<4x256xf32>
    %107 = arith.select %105, %103, %106 : vector<4x256xi1>, vector<4x256xf32>
    %108 = arith.maximumf %102, %107 : vector<4x256xf32>
    %c32_i32_43 = arith.constant 32 : i32
    %109 = tpu.dynamic_rotate %108 by %c32_i32_43 dim 1 : vector<4x256xf32>, i32 -> vector<4x256xf32>
    %cst_44 = arith.constant 0xFF800000 : f32
    %110 = vector.shape_cast %24 : vector<1x256xi1> to vector<1x256xi1>
    %111 = vector.broadcast %110 : vector<1x256xi1> to vector<4x256xi1>
    %112 = vector.broadcast %cst_44 : f32 to vector<4x256xf32>
    %113 = arith.select %111, %109, %112 : vector<4x256xi1>, vector<4x256xf32>
    %114 = arith.maximumf %108, %113 : vector<4x256xf32>
    %c16_i32_45 = arith.constant 16 : i32
    %115 = tpu.dynamic_rotate %108 by %c16_i32_45 dim 1 : vector<4x256xf32>, i32 -> vector<4x256xf32>
    %cst_46 = arith.constant 0xFF800000 : f32
    %116 = vector.shape_cast %28 : vector<1x256xi1> to vector<1x256xi1>
    %117 = vector.broadcast %116 : vector<1x256xi1> to vector<4x256xi1>
    %118 = vector.broadcast %cst_46 : f32 to vector<4x256xf32>
    %119 = arith.select %117, %115, %118 : vector<4x256xi1>, vector<4x256xf32>
    %120 = arith.maximumf %114, %119 : vector<4x256xf32>
    %c240_i32_47 = arith.constant 240 : i32
    %121 = tpu.dynamic_rotate %108 by %c240_i32_47 dim 1 : vector<4x256xf32>, i32 -> vector<4x256xf32>
    %cst_48 = arith.constant 0xFF800000 : f32
    %122 = vector.shape_cast %32 : vector<1x256xi1> to vector<1x256xi1>
    %123 = vector.broadcast %122 : vector<1x256xi1> to vector<4x256xi1>
    %124 = vector.broadcast %cst_48 : f32 to vector<4x256xf32>
    %125 = arith.select %123, %121, %124 : vector<4x256xi1>, vector<4x256xf32>
    %126 = arith.maximumf %120, %125 : vector<4x256xf32>
    %c224_i32_49 = arith.constant 224 : i32
    %127 = tpu.dynamic_rotate %108 by %c224_i32_49 dim 1 : vector<4x256xf32>, i32 -> vector<4x256xf32>
    %cst_50 = arith.constant 0xFF800000 : f32
    %128 = vector.shape_cast %36 : vector<1x256xi1> to vector<1x256xi1>
    %129 = vector.broadcast %128 : vector<1x256xi1> to vector<4x256xi1>
    %130 = vector.broadcast %cst_50 : f32 to vector<4x256xf32>
    %131 = arith.select %129, %127, %130 : vector<4x256xi1>, vector<4x256xf32>
    %132 = arith.maximumf %126, %131 : vector<4x256xf32>
    %c2_i32_51 = arith.constant 2 : i32
    %133 = tpu.dynamic_rotate %132 by %c2_i32_51 dim 1 : vector<4x256xf32>, i32 -> vector<4x256xf32>
    %cst_52 = arith.constant 0xFF800000 : f32
    %134 = vector.shape_cast %8 : vector<1x256xi1> to vector<1x256xi1>
    %135 = vector.broadcast %134 : vector<1x256xi1> to vector<4x256xi1>
    %136 = vector.broadcast %cst_52 : f32 to vector<4x256xf32>
    %137 = arith.select %135, %133, %136 : vector<4x256xi1>, vector<4x256xf32>
    %138 = arith.maximumf %132, %137 : vector<4x256xf32>
    %c1_i32_53 = arith.constant 1 : i32
    %139 = tpu.dynamic_rotate %132 by %c1_i32_53 dim 1 : vector<4x256xf32>, i32 -> vector<4x256xf32>
    %cst_54 = arith.constant 0xFF800000 : f32
    %140 = vector.shape_cast %12 : vector<1x256xi1> to vector<1x256xi1>
    %141 = vector.broadcast %140 : vector<1x256xi1> to vector<4x256xi1>
    %142 = vector.broadcast %cst_54 : f32 to vector<4x256xf32>
    %143 = arith.select %141, %139, %142 : vector<4x256xi1>, vector<4x256xf32>
    %144 = arith.maximumf %138, %143 : vector<4x256xf32>
    %c255_i32_55 = arith.constant 255 : i32
    %145 = tpu.dynamic_rotate %132 by %c255_i32_55 dim 1 : vector<4x256xf32>, i32 -> vector<4x256xf32>
    %cst_56 = arith.constant 0xFF800000 : f32
    %146 = vector.shape_cast %16 : vector<1x256xi1> to vector<1x256xi1>
    %147 = vector.broadcast %146 : vector<1x256xi1> to vector<4x256xi1>
    %148 = vector.broadcast %cst_56 : f32 to vector<4x256xf32>
    %149 = arith.select %147, %145, %148 : vector<4x256xi1>, vector<4x256xf32>
    %150 = arith.maximumf %144, %149 : vector<4x256xf32>
    %c254_i32_57 = arith.constant 254 : i32
    %151 = tpu.dynamic_rotate %132 by %c254_i32_57 dim 1 : vector<4x256xf32>, i32 -> vector<4x256xf32>
    %cst_58 = arith.constant 0xFF800000 : f32
    %152 = vector.shape_cast %20 : vector<1x256xi1> to vector<1x256xi1>
    %153 = vector.broadcast %152 : vector<1x256xi1> to vector<4x256xi1>
    %154 = vector.broadcast %cst_58 : f32 to vector<4x256xf32>
    %155 = arith.select %153, %151, %154 : vector<4x256xi1>, vector<4x256xf32>
    %156 = arith.maximumf %150, %155 : vector<4x256xf32>
    %c32_i32_59 = arith.constant 32 : i32
    %157 = tpu.dynamic_rotate %156 by %c32_i32_59 dim 1 : vector<4x256xf32>, i32 -> vector<4x256xf32>
    %cst_60 = arith.constant 0xFF800000 : f32
    %158 = vector.shape_cast %24 : vector<1x256xi1> to vector<1x256xi1>
    %159 = vector.broadcast %158 : vector<1x256xi1> to vector<4x256xi1>
    %160 = vector.broadcast %cst_60 : f32 to vector<4x256xf32>
    %161 = arith.select %159, %157, %160 : vector<4x256xi1>, vector<4x256xf32>
    %162 = arith.maximumf %156, %161 : vector<4x256xf32>
    %c16_i32_61 = arith.constant 16 : i32
    %163 = tpu.dynamic_rotate %156 by %c16_i32_61 dim 1 : vector<4x256xf32>, i32 -> vector<4x256xf32>
    %cst_62 = arith.constant 0xFF800000 : f32
    %164 = vector.shape_cast %28 : vector<1x256xi1> to vector<1x256xi1>
    %165 = vector.broadcast %164 : vector<1x256xi1> to vector<4x256xi1>
    %166 = vector.broadcast %cst_62 : f32 to vector<4x256xf32>
    %167 = arith.select %165, %163, %166 : vector<4x256xi1>, vector<4x256xf32>
    %168 = arith.maximumf %162, %167 : vector<4x256xf32>
    %c240_i32_63 = arith.constant 240 : i32
    %169 = tpu.dynamic_rotate %156 by %c240_i32_63 dim 1 : vector<4x256xf32>, i32 -> vector<4x256xf32>
    %cst_64 = arith.constant 0xFF800000 : f32
    %170 = vector.shape_cast %32 : vector<1x256xi1> to vector<1x256xi1>
    %171 = vector.broadcast %170 : vector<1x256xi1> to vector<4x256xi1>
    %172 = vector.broadcast %cst_64 : f32 to vector<4x256xf32>
    %173 = arith.select %171, %169, %172 : vector<4x256xi1>, vector<4x256xf32>
    %174 = arith.maximumf %168, %173 : vector<4x256xf32>
    %c224_i32_65 = arith.constant 224 : i32
    %175 = tpu.dynamic_rotate %156 by %c224_i32_65 dim 1 : vector<4x256xf32>, i32 -> vector<4x256xf32>
    %cst_66 = arith.constant 0xFF800000 : f32
    %176 = vector.shape_cast %36 : vector<1x256xi1> to vector<1x256xi1>
    %177 = vector.broadcast %176 : vector<1x256xi1> to vector<4x256xi1>
    %178 = vector.broadcast %cst_66 : f32 to vector<4x256xf32>
    %179 = arith.select %177, %175, %178 : vector<4x256xi1>, vector<4x256xf32>
    %180 = arith.maximumf %174, %179 : vector<4x256xf32>
    %c0_67 = arith.constant 0 : index
    %c0_68 = arith.constant 0 : index
    %181 = vector.load %arg5[%c0_67, %c0_68] : memref<8x4xf32, #tpu.memory_space<vmem>>, vector<8x4xf32>
    %cst_69 = arith.constant dense<0.000000e+00> : vector<8x256xf32>
    %182 = tpu.matmul %181, %4, %cst_69 {dimension_numbers = #tpu.dot_dimension_numbers<[1], [0], [0], [1], [0, 0, 1, 1], [], []>} : vector<8x4xf32>, vector<4x256xf32>, vector<8x256xf32> -> vector<8x256xf32>
    %c0_70 = arith.constant 0 : index
    %c0_71 = arith.constant 0 : index
    %183 = vector.load %arg6[%c0_70, %c0_71] : memref<8x4xf32, #tpu.memory_space<vmem>>, vector<8x4xf32>
    %cst_72 = arith.constant dense<0.000000e+00> : vector<8x256xf32>
    %184 = tpu.matmul %183, %84, %cst_72 {dimension_numbers = #tpu.dot_dimension_numbers<[1], [0], [0], [1], [0, 0, 1, 1], [], []>} : vector<8x4xf32>, vector<4x256xf32>, vector<8x256xf32> -> vector<8x256xf32>
    %185 = arith.addf %182, %184 : vector<8x256xf32>
    %c0_73 = arith.constant 0 : index
    %c0_74 = arith.constant 0 : index
    %186 = vector.load %arg7[%c0_73, %c0_74] : memref<8x4xf32, #tpu.memory_space<vmem>>, vector<8x4xf32>
    %cst_75 = arith.constant dense<0.000000e+00> : vector<8x256xf32>
    %187 = tpu.matmul %186, %132, %cst_75 {dimension_numbers = #tpu.dot_dimension_numbers<[1], [0], [0], [1], [0, 0, 1, 1], [], []>} : vector<8x4xf32>, vector<4x256xf32>, vector<8x256xf32> -> vector<8x256xf32>
    %188 = arith.addf %185, %187 : vector<8x256xf32>
    %c0_76 = arith.constant 0 : index
    %c0_77 = arith.constant 0 : index
    %189 = vector.load %arg8[%c0_76, %c0_77] : memref<8x4xf32, #tpu.memory_space<vmem>>, vector<8x4xf32>
    %cst_78 = arith.constant dense<0.000000e+00> : vector<8x256xf32>
    %190 = tpu.matmul %189, %180, %cst_78 {dimension_numbers = #tpu.dot_dimension_numbers<[1], [0], [0], [1], [0, 0, 1, 1], [], []>} : vector<8x4xf32>, vector<4x256xf32>, vector<8x256xf32> -> vector<8x256xf32>
    %191 = arith.addf %188, %190 : vector<8x256xf32>
    %c0_79 = arith.constant 0 : index
    %c0_80 = arith.constant 0 : index
    %192 = vector.load %arg12[%c0_79, %c0_80] : memref<8x256xf32, #tpu.memory_space<vmem>>, vector<8x256xf32>
    %193 = arith.addf %192, %191 : vector<8x256xf32>
    %c0_81 = arith.constant 0 : index
    %c0_82 = arith.constant 0 : index
    %194 = vector.load %arg12[%c0_81, %c0_82] : memref<8x256xf32, #tpu.memory_space<vmem>>, vector<8x256xf32>
    tpu.vector_store %arg12[%c0_81, %c0_82], %193 {strides = array<i32>} : memref<8x256xf32, #tpu.memory_space<vmem>>, vector<8x256xf32>,
    %c0_i32_83 = arith.constant 0 : i32
    %195 = arith.cmpi eq, %arg2, %c0_i32_83 : i32
    %196 = arith.extui %195 : i1 to i32
    %c0_i32_84 = arith.constant 0 : i32
    %197 = arith.cmpi ne, %196, %c0_i32_84 : i32
    scf.if %197 {
      %c0_85 = arith.constant 0 : index
      %c0_86 = arith.constant 0 : index
      %198 = vector.load %arg12[%c0_85, %c0_86] : memref<8x256xf32, #tpu.memory_space<vmem>>, vector<8x256xf32>
      %c0_87 = arith.constant 0 : index
      %c0_88 = arith.constant 0 : index
      %199 = vector.load %arg9[%c0_87, %c0_88] : memref<8x1xf32, #tpu.memory_space<vmem>>, vector<8x1xf32>
      %200 = vector.broadcast %199 : vector<8x1xf32> to vector<8x256xf32>
      %201 = arith.mulf %198, %200 : vector<8x256xf32>
      %c0_89 = arith.constant 0 : index
      %c0_90 = arith.constant 0 : index
      %202 = vector.load %arg10[%c0_89, %c0_90] : memref<8x1xf32, #tpu.memory_space<vmem>>, vector<8x1xf32>
      %203 = vector.broadcast %202 : vector<8x1xf32> to vector<8x256xf32>
      %204 = arith.addf %201, %203 : vector<8x256xf32>
      %cst_91 = arith.constant 0.000000e+00 : f32
      %205 = vector.broadcast %cst_91 : f32 to vector<8x256xf32>
      %206 = arith.subf %205, %204 : vector<8x256xf32>
      %207 = math.exp %206 : vector<8x256xf32>
      %cst_92 = arith.constant 1.000000e+00 : f32
      %208 = vector.broadcast %cst_92 : f32 to vector<8x256xf32>
      %209 = arith.addf %208, %207 : vector<8x256xf32>
      %210 = tpu.reciprocal %209 {approx = true} : vector<8x256xf32> -> vector<8x256xf32>
      %211 = arith.mulf %204, %210 : vector<8x256xf32>
      %c0_93 = arith.constant 0 : index
      %c0_94 = arith.constant 0 : index
      %c0_95 = arith.constant 0 : index
      %212 = vector.load %arg11[%c0_93, %c0_94, %c0_95] : memref<1x8x256xf32, #tpu.memory_space<vmem>>, vector<1x8x256xf32>
      %213 = vector.shape_cast %212 : vector<1x8x256xf32> to vector<8x256xf32>
      %214 = vector.shape_cast %211 : vector<8x256xf32> to vector<1x8x256xf32>
      tpu.vector_store %arg11[%c0_93, %c0_94, %c0_95], %214 {strides = array<i32>} : memref<1x8x256xf32, #tpu.memory_space<vmem>>, vector<1x8x256xf32>,
    } else {
    }
    return
  }
  func.func @transform_0(%arg0: i32, %arg1: i32, %arg2: i32) -> (i32, i32, i32) {
    %c0_i32 = arith.constant 0 : i32
    %c0_i32_0 = arith.constant 0 : i32
    %c0_i32_1 = arith.constant 0 : i32
    %c0_i32_2 = arith.constant 0 : i32
    return %c0_i32, %c0_i32_0, %c0_i32_1 : i32, i32, i32
  }
  func.func @transform_1(%arg0: i32, %arg1: i32, %arg2: i32) -> (i32, i32, i32) {
    %c0_i32 = arith.constant 0 : i32
    %c0_i32_0 = arith.constant 0 : i32
    return %arg0, %arg2, %c0_i32 : i32, i32, i32
  }
  func.func @transform_2(%arg0: i32, %arg1: i32, %arg2: i32) -> (i32, i32) {
    %c0_i32 = arith.constant 0 : i32
    return %arg1, %arg2 : i32, i32
  }
  func.func @transform_3(%arg0: i32, %arg1: i32, %arg2: i32) -> (i32, i32) {
    %c0_i32 = arith.constant 0 : i32
    return %arg1, %arg2 : i32, i32
  }
  func.func @transform_4(%arg0: i32, %arg1: i32, %arg2: i32) -> (i32, i32) {
    %c0_i32 = arith.constant 0 : i32
    return %arg1, %arg2 : i32, i32
  }
  func.func @transform_5(%arg0: i32, %arg1: i32, %arg2: i32) -> (i32, i32) {
    %c0_i32 = arith.constant 0 : i32
    return %arg1, %arg2 : i32, i32
  }
  func.func @transform_6(%arg0: i32, %arg1: i32, %arg2: i32) -> (i32, i32) {
    %c0_i32 = arith.constant 0 : i32
    %c0_i32_0 = arith.constant 0 : i32
    return %arg1, %c0_i32 : i32, i32
  }
  func.func @transform_7(%arg0: i32, %arg1: i32, %arg2: i32) -> (i32, i32) {
    %c0_i32 = arith.constant 0 : i32
    %c0_i32_0 = arith.constant 0 : i32
    return %arg1, %c0_i32 : i32, i32
  }
  func.func @transform_8(%arg0: i32, %arg1: i32, %arg2: i32) -> (i32, i32, i32) {
    %c0_i32 = arith.constant 0 : i32
    %c0_i32_0 = arith.constant 0 : i32
    return %arg0, %arg1, %c0_i32 : i32, i32, i32
  }
}

</mosaic_0001>

<bundles_post_ra>
// kernel: sppf_forward.2
= control target key start
LH: loop header
LB: loop body
LE: loop exit
PB: predicated region body
PF: predicated region fallthrough
CT: control target
= control target key end

     0   :  { %s505_s15 = smov 0   ;;  %s507_s16 = smov 0   ;;  %s551_s0 = inlined_call_operand.vmem [shape: f32[2,8,256], index: 0, kind: input, shape index: {}]   ;;  %s552_s1 = inlined_call_operand.vmem [shape: f32[4,8], index: 1, kind: input, shape index: {}]   ;;  %s553_s2 = inlined_call_operand.vmem [shape: f32[4,1], index: 2, kind: input, shape index: {}]   ;;  %s554_s3 = inlined_call_operand.vmem [shape: f32[4,1], index: 3, kind: input, shape index: {}]   ;;  %s555_s4 = inlined_call_operand.vmem [shape: f32[2,4,256], index: 4, kind: output, shape index: {}]  }
   0x1   :  { %s509_s17 = smov 0  }
   0x2 LB: > { %s26_s18 = sadd.s32 1, %s473_s16  ;;  %p410_p0 = scmp.ge.s32.totalorder %s477_s17, 1  ;;  %s477_s17 = sphi %s509_s17, %s14_s17   ;;  %s473_s16 = sphi %s507_s16, %s557_s16   ;;  %s469_s15 = sphi %s505_s15, %s556_s15  }
   0x3   : > { %p28_p1 = scmp.ge.s32.totalorder %s26_s18, 2  ;;  %p183_p2 = scmp.lt.s32.totalorder %s477_s17, 3 }
   0x5   : > { %s559_s18 = smov (%p28_p1, %s26_s18), 0  ;;  %p184_p3 = pnand %p410_p0, %p183_p2 }
   0x6   : > { %p218_p4 = scmp.lt.s32.totalorder (!%p184_p3), %s469_s15, 1 }
   0x7   : > { %187 = sbr.rel (%p184_p3) target bundleno = 174 (0xae), region = 36 }
   0xc   : > { %v284_v0 = vld [vmem:[%s553_s2] sm:$0xf]  ;;  %v479_v1 = vmov 0   ;;  %s561_s15 = smov (!%p218_p4, %s469_s15), 1  ;;  %vm240_vm0 = vcmask 64512   ;;  %vm315_vm1 = vcmask 1043456  }
   0xd   : > { %446 = vset.pattern.permute.xlu0 %v479_v1  ;;  %s419_s21 = sshll.u32 %s561_s15, 4  ;;  %v239_v2 = vld [vmem:[%s552_s1] sm:$0xf]  ;;  %s420_s29 = sshll.u32 %s561_s15, 3 }
   0xe   : > { %287 = vperm.xlu0 %446, %v284_v0   ;;  %s225_s24 = scalar_lea.vmem %s551_s0, %s419_s21  ;;  %v292_v5 = vld [vmem:[%s554_s3] sm:$0xf]  ;;  %s235_s6 = scalar_lea.vmem %s555_s4, %s420_s29 }
   0xf   : > { %v237_v3 = vld [vmem:[%s225_s24] sm:$0xff]  ;;  %v238_v4 = vld [vmem:[%s225_s24 + $0x8] sm:$0xff] }
  0x10   : > { %259 = vmatpush.msra.mxu0 %v237_v3  ;;  %279 = vmatpush.msra.mxu1 %v238_v4 }
  0x11   : > { %415 = vmatmul.msk.f32.vlgmr.msra.gmra.mxu0 %vm240_vm0, %v239_v2  ;;  %416 = vmatmul.msk.f32.vlgmr.msra.gmra.mxu1 %vm240_vm0, %v239_v2 }
  0x16   : > { %295 = vperm.xlu0 %446, %v292_v5  }
  0x80   : > { %v288_v6 = vpop.permute.xlu0 %287 }
  0x88   : > { %v296_v11 = vpop.permute.xlu0 %295 }
  0x8e   : > { %v261_v7 = vpop.f32.mrf.mxu0  ;;  %v281_v8 = vpop.f32.mrf.mxu1 }
  0x8f   : > { %v290_v9 = vmul.f32 %v288_v6, %v261_v7  ;;  %v291_v10 = vmul.f32 %v288_v6, %v281_v8 }
  0x91   : > { %v298_v12 = vadd.f32 %v296_v11, %v290_v9  ;;  %v299_v13 = vadd.f32 %v296_v11, %v291_v10 }
  0x93   : > { %v300_v14 = vsub.f32 0.0, %v298_v12  ;;  %v301_v15 = vsub.f32 0.0, %v299_v13 }
  0x95   : > { %v302_v16 = vmul.f32 1.442695, %v300_v14  ;;  %v304_v17 = vmul.f32 1.442695, %v301_v15 }
  0x97   : > { %447 = vpow2.f32 %v302_v16 }
  0x98   : > { %449 = vpow2.f32 %v304_v17 }
  0x9d   : > { %v448_v18 = vpop.eup %447 }
  0x9e   : > { %v450_v19 = vpop.eup %449  ;;  %v306_v20 = vadd.f32 1.0, %v448_v18 }
  0x9f   : > { %v307_v21 = vadd.f32 1.0, %v450_v19 }
  0xa0   : > { %451 = vrcp.f32 %v306_v20 }
  0xa1   : > { %453 = vrcp.f32 %v307_v21 }
  0xa6   : > { %v452_v22 = vpop.eup %451 }
  0xa7   : > { %v454_v23 = vpop.eup %453  ;;  %v310_v25 = vmul.f32 %v452_v22, %v298_v12 }
  0xa8   : > { %v311_v24 = vmul.f32 %v454_v23, %v299_v13 }
  0xaa   : > { %v314_v26 = vrot.slane %v311_v24, 4 }
  0xac   : > { %v316_v27 = vsel %vm315_vm1, %v310_v25, %v314_v26 }
  0xad   : > { %318 = vst [vmem:[%s235_s6] sm:$0xff] %v316_v27 }
  0xae PF: > { %s14_s17 = sadd.s32 1, %s477_s17   ;;  %s556_s15 = smov %s473_s16 }
  0xaf   : > { %p11_p5 = scmp.ge.s32.totalorder %s14_s17, 4   ;;  %s557_s16 = smov %s559_s18 }
  0xb1   :  { %13 = sbr.rel (!%p11_p5) target bundleno = 2 (0x2), region = 66 }

// kernel: sppf_forward.3
= control target key start
LH: loop header
LB: loop body
LE: loop exit
PB: predicated region body
PF: predicated region fallthrough
CT: control target
= control target key end

     0   :  { %s1650_s27 = smov 0   ;;  %s1652_s28 = smov 0   ;;  %s2131_s0 = inlined_call_operand.vmem [shape: f32[8,1,256], index: 0, kind: input, shape index: {}]   ;;  %s2132_s1 = inlined_call_operand.vmem [shape: f32[2,4,256], index: 1, kind: input, shape index: {}]   ;;  %s2133_s2 = inlined_call_operand.vmem [shape: f32[8,4], index: 2, kind: input, shape index: {}]   ;;  %s2134_s3 = inlined_call_operand.vmem [shape: f32[8,4], index: 3, kind: input, shape index: {}]   ;;  %s2135_s4 = inlined_call_operand.vmem [shape: f32[8,4], index: 4, kind: input, shape index: {}]   ;;  %s2136_s5 = inlined_call_operand.vmem [shape: f32[8,4], index: 5, kind: input, shape index: {}]   ;;  %s2137_s6 = inlined_call_operand.vmem [shape: f32[8,1], index: 6, kind: input, shape index: {}]   ;;  %s2138_s7 = inlined_call_operand.vmem [shape: f32[8,1], index: 7, kind: input, shape index: {}]   ;;  %s2139_s8 = inlined_call_operand.vmem [shape: f32[2,8,256], index: 8, kind: output, shape index: {}]  }
   0x1   :  { %s1654_s29 = smov 0  }
   0x2 LB: > { %s37_s30 = sadd.s32 1, %s1590_s28  ;;  %p1497_p0 = scmp.ge.s32.totalorder %s1594_s29, 1  ;;  %s1594_s29 = sphi %s1654_s29, %s18_s29   ;;  %s1590_s28 = sphi %s1652_s28, %s2258_s28   ;;  %s1586_s27 = sphi %s1650_s27, %s2257_s27  }
   0x3   : > { %p39_p1 = scmp.ge.s32.totalorder %s37_s30, 2  ;;  %p363_p2 = scmp.lt.s32.totalorder %s1594_s29, 3 }
   0x5   : > { %s2260_s30 = smov (%p39_p1, %s37_s30), 0  ;;  %p364_p3 = pnand %p1497_p0, %p363_p2 }
   0x6   : > { %p441_p4 = scmp.lt.s32.totalorder (!%p364_p3), %s1586_s27, 1  ;;  %s1596_s13 = smov (!%p364_p3), 2  }
   0x7   : > { %367 = sbr.rel (%p364_p3) target bundleno = 1111 (0x457), region = 52  ;;  %s1597_s14 = smov (!%p364_p3), 1  }
   0x8   : > { %s1598_s15 = smov (!%p364_p3), 127   ;;  %s1599_s16 = smov (!%p364_p3), 126  }
   0x9   : > { %s1601_s25 = smov (!%p364_p3), 32   ;;  %s1602_s26 = smov (!%p364_p3), 16  }
   0xa   : > { %s1604_s10 = smov (!%p364_p3), 96  }
   0xc   : > { %s2262_s27 = smov (!%p441_p4, %s1586_s27), 1  ;;  %v1600_v9 = vmov 0   ;;  %v502_v10 = vld [vmem:[%s2131_s0] sm:$0x3]  ;;  %v535_v11 = vlaneseq  ;;  %v1502_v15 = vld [vmem:[%s2131_s0 + $0x2] sm:$0x3] }
   0xd   : > { %s1527_s9 = sshll.u32 %s2262_s27, 3  ;;  %1562 = vset.pattern.permute.xlu0 %v1600_v9  ;;  %1563 = vset.pattern.permute.xlu1 %v1600_v9  ;;  %vm503_vm0 = vcmp.gt.f32.partialorder %v502_v10, 0.5  ;;  %v1503_v16 = vld [vmem:[%s2131_s0 + $0x4] sm:$0x3]  ;;  %vm506_vm1 = vcmp.gt.f32.partialorder %v1502_v15, 0.5  ;;  %v2163_v35 = vmov 0 }
   0xe   : > { %s449_s12 = scalar_lea.vmem %s2132_s1, %s1527_s9  ;;  %v1693_v13 = vand.u32 127, %v535_v11  ;;  %v540_v14 = vsel %vm503_vm0, 1, %v1600_v9  ;;  %vm509_vm3 = vcmp.gt.f32.partialorder %v1503_v16, 0.5  ;;  %v566_v21 = vsel %vm506_vm1, 1, %v1600_v9  ;;  %v1504_v25 = vld [vmem:[%s2131_s0 + $0x6] sm:$0x3] }
   0xf   : > { %v1674_v0 = vld [vmem:[%s449_s12] sm:$0xff]  ;;  %v542_v18 = vperm.slane %v540_v14, 1  ;;  %v591_v24 = vsel %vm509_vm3, 1, %v1600_v9  ;;  %v541_v26 = vperm.slane %v540_v14, 0  ;;  %v568_v27 = vperm.slane %v566_v21, 1  ;;  %s1603_s9 = smov 112  }
  0x10   : > { %526 = vst [vmem:[#allocation1] ss:$2 sm:$0xff] %v1674_v0  ;;  %vm2143_vm2 = vcmp.lt.s32.totalorder %v1693_v13, 2  ;;  %v593_v29 = vperm.slane %v591_v24, 1  ;;  %v567_v30 = vperm.slane %v566_v21, 0  ;;  %vm512_vm5 = vcmp.gt.f32.partialorder %v1504_v25, 0.5 }
  0x11   : > { %vm1704_vm4 = vcmp.eq.s32.totalorder %v542_v18, 1  ;;  %vm2141_vm6 = vcmp.lt.s32.totalorder %v1693_v13, 127  ;;  %vm2142_vm7 = vcmp.lt.s32.totalorder %v1693_v13, 1  ;;  %vm1718_vm8 = vcmp.eq.s32.totalorder %v541_v26, 1  ;;  %s1528_s17 = sshll.u32 %s2262_s27, 4 }
  0x12   : > { %vm1724_vm9 = vcmp.eq.s32.totalorder %v568_v27, 1  ;;  %vm2144_vm10 = vcmask 1043456   ;;  %v592_v36 = vperm.slane %v591_v24, 0  ;;  %vm1728_vm11 = vcmp.eq.s32.totalorder %v593_v29, 1  ;;  %s494_s20 = scalar_lea.vmem %s2139_s8, %s1528_s17 }
  0x13   : > { %v2164_v35 = vsel %vm1724_vm9, 4294967295, %v2163_v35  ;;  %v616_v39 = vsel %vm512_vm5, 1, %v1600_v9  ;;  %vm1735_vm12 = vcmp.eq.s32.totalorder %v567_v30, 1  ;;  %vm2140_vm14 = vcmp.lt.s32.totalorder %v1693_v13, 126 }
  0x14   : > { %v618_v48 = vperm.slane %v616_v39, 1  ;;  %vm1752_vm13 = vcmp.eq.s32.totalorder %v592_v36, 1  ;;  %v617_v54 = vperm.slane %v616_v39, 0  ;;  %v2173_v62 = vmov 0 }
  0x16   : > { %vm1761_vm15 = vcmp.eq.s32.totalorder %v618_v48, 1  ;;  %vm1767_vm0 = vcmp.eq.s32.totalorder %v617_v54, 1 }
  0x17   : > { %v527_v1 = vld.sshfl [vmem:[#allocation1] sm:$0xff pattern:$0x75316420]  ;;  %v528_v2 = vld.sshfl [vmem:[#allocation1 + $0x8] sm:$0xff pattern:$0x75316420] }
  0x18   : > { %531 = vrot.lane.b32.xlu0 %v527_v1, %s1596_s13  ;;  %554 = vst [vmem:[#allocation1] ss:$2 sm:$0xff] %v1674_v0  ;;  %v2174_v62 = vsel %vm1767_vm0, 4294967295, %v2173_v62 }
  0x1f   : > { %v555_v3 = vld.sshfl [vmem:[#allocation1] sm:$0xff pattern:$0x75316420]  ;;  %v556_v4 = vld.sshfl [vmem:[#allocation1 + $0x8] sm:$0xff pattern:$0x75316420] }
  0x20   : > { %533 = vrot.lane.b32.xlu0 %v528_v2, %s1596_s13  ;;  %559 = vrot.lane.b32.xlu1 %v555_v3, %s1597_s14  ;;  %579 = vst [vmem:[#allocation1] ss:$2 sm:$0xff] %v1674_v0 }
  0x27   : > { %v580_v5 = vld.sshfl [vmem:[#allocation1] sm:$0xff pattern:$0x75316420]  ;;  %v581_v6 = vld.sshfl [vmem:[#allocation1 + $0x8] sm:$0xff pattern:$0x75316420] }
  0x28   : > { %561 = vrot.lane.b32.xlu1 %v556_v4, %s1597_s14  ;;  %604 = vst [vmem:[#allocation1] ss:$2 sm:$0xff] %v1674_v0  ;;  %584 = vrot.lane.b32.xlu2 %v580_v5, %s1598_s15 }
  0x2f   : > { %v606_v7 = vld.sshfl [vmem:[#allocation1 + $0x8] sm:$0xff pattern:$0x75316420]  ;;  %v605_v8 = vld.sshfl [vmem:[#allocation1] sm:$0xff pattern:$0x75316420] }
  0x30   : > { %611 = vrot.lane.b32.xlu1 %v606_v7, %s1599_s16  ;;  %609 = vrot.lane.b32.xlu0 %v605_v8, %s1599_s16 }
  0x31   : > { %586 = vrot.lane.b32.xlu2 %v581_v6, %s1598_s15 }
  0x82   : > { %v585_v17 = vpop.permute.xlu2 %584 }
  0x8a   : > { %v532_v12 = vpop.permute.xlu0 %531 }
  0x8b   : > { %v587_v31 = vpop.permute.xlu2 %586 }
  0x8c   : > { %v590_v40 = vsel %vm2141_vm6, %v587_v31, %v585_v17  ;;  %v589_v52 = vsel %vm2141_vm6, %v585_v17, %v587_v31  ;;  %vm2145_vm6 = vcmp.lt.s32.totalorder %v1693_v13, 16  ;;  %v1508_v31 = vld [vmem:[%s2131_s0 + $0xe] sm:$0x3] }
  0x8d   : > { %v597_v49 = vsel %vm1728_vm11, %v590_v40, -inf  ;;  %v596_v58 = vsel %vm1752_vm13, %v589_v52, -inf  ;;  %v2177_v40 = vmov 0 }
  0x8e   : > { %v600_v56 = vrot.slane %v597_v49, 4 }
  0x90   : > { %v601_v3 = vsel %vm2144_vm10, %v596_v58, %v600_v56 }
  0x92   : > { %v534_v19 = vpop.permute.xlu0 %533  ;;  %v560_v20 = vpop.permute.xlu1 %559 }
  0x93   : > { %v538_v23 = vsel %vm2143_vm2, %v532_v12, %v534_v19  ;;  %v539_v33 = vsel %vm2143_vm2, %v534_v19, %v532_v12  ;;  %v1505_v19 = vld [vmem:[%s2131_s0 + $0x8] sm:$0x3] }
  0x94   : > { %v546_v28 = vsel %vm1704_vm4, %v538_v23, -inf  ;;  %v545_v44 = vsel %vm1718_vm8, %v539_v33, -inf  ;;  %vm515_vm1 = vcmp.gt.f32.partialorder %v1505_v19, 0.5  ;;  %v1507_v23 = vld [vmem:[%s2131_s0 + $0xc] sm:$0x3]  ;;  %v2175_v33 = vmov 0 }
  0x95   : > { %v549_v34 = vrot.slane %v546_v28, 4  ;;  %v642_v24 = vsel %vm515_vm1, 1, %v1600_v9  ;;  %vm521_vm5 = vcmp.gt.f32.partialorder %v1507_v23, 0.5 }
  0x96   : > { %v644_v26 = vperm.slane %v642_v24, 1  ;;  %v692_v29 = vsel %vm521_vm5, 1, %v1600_v9  ;;  %v643_v39 = vperm.slane %v642_v24, 0  ;;  %vm2147_vm5 = vcmp.lt.s32.totalorder %v1693_v13, 112 }
  0x97   : > { %v551_v46 = vsel %vm2144_vm10, %v545_v44, %v549_v34  ;;  %v694_v36 = vperm.slane %v692_v29, 1  ;;  %v693_v48 = vperm.slane %v692_v29, 0 }
  0x98   : > { %v553_v55 = vmax.f32 %v1674_v0, %v551_v46 }
  0x99   : > { %vm1827_vm2 = vcmp.eq.s32.totalorder %v694_v36, 1 }
  0x9a   : > { %v562_v38 = vpop.permute.xlu1 %561 }
  0x9b   : > { %v564_v42 = vsel %vm2142_vm7, %v560_v20, %v562_v38  ;;  %v565_v43 = vsel %vm2142_vm7, %v562_v38, %v560_v20  ;;  %v1506_v20 = vld [vmem:[%s2131_s0 + $0xa] sm:$0x3]  ;;  %vm1812_vm7 = vcmp.eq.s32.totalorder %v644_v26, 1 }
  0x9c   : > { %v572_v45 = vsel %vm1724_vm9, %v564_v42, -inf  ;;  %v571_v50 = vsel %vm1735_vm12, %v565_v43, -inf  ;;  %vm518_vm3 = vcmp.gt.f32.partialorder %v1506_v20, 0.5  ;;  %v2176_v33 = vsel %vm1812_vm7, 4294967295, %v2175_v33 }
  0x9d   : > { %v575_v47 = vrot.slane %v572_v45, 4  ;;  %v667_v25 = vsel %vm518_vm3, 1, %v1600_v9  ;;  %vm524_vm3 = vcmp.gt.f32.partialorder %v1508_v31, 0.5  ;;  %v2179_v45 = vmov 0 }
  0x9e   : > { %v669_v30 = vperm.slane %v667_v25, 1  ;;  %v668_v44 = vperm.slane %v667_v25, 0  ;;  %v2180_v45 = vsel %vm1827_vm2, 4294967295, %v2179_v45 }
  0x9f   : > { %v576_v53 = vsel %vm2144_vm10, %v571_v50, %v575_v47  ;;  %v717_v50 = vsel %vm524_vm3, 1, %v1600_v9  ;;  %vm2185_vm3 = vcmp.lt.s32.totalorder %v1693_v13, 16 }
  0xa0   : > { %v578_v59 = vmax.f32 %v553_v55, %v576_v53  ;;  %vm1818_vm1 = vcmp.eq.s32.totalorder %v669_v30, 1 }
  0xa1   : > { %v2178_v40 = vsel %vm1818_vm1, 4294967295, %v2177_v40 }
  0xa2   : > { %v612_v60 = vpop.permute.xlu1 %611  ;;  %v610_v61 = vpop.permute.xlu0 %609  ;;  %v603_v5 = vmax.f32 %v578_v59, %v601_v3 }
  0xa3   : > { %v614_v63 = vsel %vm2140_vm14, %v610_v61, %v612_v60  ;;  %v615_v1 = vsel %vm2140_vm14, %v612_v60, %v610_v61  ;;  %vm2146_vm14 = vcmp.lt.s32.totalorder %v1693_v13, 32  ;;  %v719_v60 = vperm.slane %v717_v50, 1 }
  0xa4   : > { %v622_v2 = vsel %vm1761_vm15, %v615_v1, -inf  ;;  %v621_v6 = vsel %vm1767_vm0, %v614_v63, -inf }
  0xa5   : > { %v625_v4 = vrot.slane %v622_v2, 4 }
  0xa7   : > { %v626_v7 = vsel %vm2144_vm10, %v621_v6, %v625_v4  ;;  %vm1834_vm10 = vcmp.eq.s32.totalorder %v643_v39, 1  ;;  %v718_v4 = vperm.slane %v717_v50, 0 }
  0xa8   : > { %v1781_v8 = vmax.f32 %v603_v5, %v626_v7 }
  0xaa   : > { %630 = vst [vmem:[#allocation1] ss:$2 sm:$0xff] %v1781_v8 }
  0xb1   : > { %v631_v10 = vld.sshfl [vmem:[#allocation1] sm:$0xff pattern:$0x75316420]  ;;  %v632_v11 = vld.sshfl [vmem:[#allocation1 + $0x8] sm:$0xff pattern:$0x75316420] }
  0xb2   : > { %655 = vst [vmem:[#allocation1] ss:$2 sm:$0xff] %v1781_v8  ;;  %637 = vrot.lane.b32.xlu0 %v632_v11, %s1601_s25  ;;  %635 = vrot.lane.b32.xlu2 %v631_v10, %s1601_s25 }
  0xb9   : > { %v656_v12 = vld.sshfl [vmem:[#allocation1] sm:$0xff pattern:$0x75316420]  ;;  %v657_v14 = vld.sshfl [vmem:[#allocation1 + $0x8] sm:$0xff pattern:$0x75316420] }
  0xba   : > { %680 = vst [vmem:[#allocation1] ss:$2 sm:$0xff] %v1781_v8  ;;  %662 = vrot.lane.b32.xlu2 %v657_v14, %s1602_s26  ;;  %660 = vrot.lane.b32.xlu1 %v656_v12, %s1602_s26 }
  0xc1   : > { %v682_v15 = vld.sshfl [vmem:[#allocation1 + $0x8] sm:$0xff pattern:$0x75316420]  ;;  %v681_v16 = vld.sshfl [vmem:[#allocation1] sm:$0xff pattern:$0x75316420] }
  0xc2   : > { %687 = vrot.lane.b32.xlu1 %v682_v15, %s1603_s9  ;;  %685 = vrot.lane.b32.xlu0 %v681_v16, %s1603_s9  ;;  %705 = vst [vmem:[#allocation1] ss:$2 sm:$0xff] %v1781_v8  ;;  %v2194_v16 = vmov 0 }
  0xc9   : > { %v707_v17 = vld.sshfl [vmem:[#allocation1 + $0x8] sm:$0xff pattern:$0x75316420]  ;;  %v706_v18 = vld.sshfl [vmem:[#allocation1] sm:$0xff pattern:$0x75316420] }
  0xca   : > { %712 = vrot.lane.b32.xlu0 %v707_v17, %s1604_s10  ;;  %710 = vrot.lane.b32.xlu2 %v706_v18, %s1604_s10 }
 0x10c   : > { %v636_v21 = vpop.permute.xlu2 %635 }
 0x114   : > { %v663_v38 = vpop.permute.xlu2 %662 }
 0x124   : > { %v638_v27 = vpop.permute.xlu0 %637  ;;  %v711_v11 = vpop.permute.xlu2 %710 }
 0x125   : > { %v640_v34 = vsel %vm2146_vm14, %v636_v21, %v638_v27  ;;  %v641_v53 = vsel %vm2146_vm14, %v638_v27, %v636_v21  ;;  %vm1852_vm14 = vcmp.eq.s32.totalorder %v693_v48, 1 }
 0x126   : > { %v648_v43 = vsel %vm1812_vm7, %v640_v34, -inf  ;;  %v647_v61 = vsel %vm1834_vm10, %v641_v53, -inf  ;;  %vm1863_vm7 = vcmp.eq.s32.totalorder %v719_v60, 1 }
 0x127   : > { %v651_v54 = vrot.slane %v648_v43, 4 }
 0x12c   : > { %v661_v28 = vpop.permute.xlu1 %660 }
 0x12d   : > { %v665_v42 = vsel %vm2145_vm6, %v661_v28, %v663_v38  ;;  %vm1844_vm6 = vcmp.eq.s32.totalorder %v668_v44, 1  ;;  %v666_v9 = vsel %vm2185_vm3, %v663_v38, %v661_v28  ;;  %vm2154_vm3 = vcmp.lt.s32.totalorder %v1693_v13, 96 }
 0x12e   : > { %v673_v46 = vsel %vm1818_vm1, %v665_v42, -inf  ;;  %v672_v5 = vsel %vm1844_vm6, %v666_v9, -inf }
 0x12f   : > { %v676_v59 = vrot.slane %v673_v46, 4 }
 0x134   : > { %v688_v47 = vpop.permute.xlu1 %687  ;;  %v686_v49 = vpop.permute.xlu0 %685 }
 0x135   : > { %v691_v55 = vsel %vm2147_vm5, %v688_v47, %v686_v49  ;;  %vm2188_vm5 = vcmask 1043456  }
 0x136   : > { %v698_v56 = vsel %vm1827_vm2, %v691_v55, -inf  ;;  %v652_v1 = vsel %vm2188_vm5, %v647_v61, %v651_v54  ;;  %vm2189_vm2 = vcmp.lt.s32.totalorder %v1693_v13, 112  ;;  %vm2190_vm1 = vmmov %vm2188_vm5  ;;  %vm1871_vm5 = vcmp.eq.s32.totalorder %v718_v4, 1 }
 0x137   : > { %v690_v2 = vsel %vm2189_vm2, %v686_v49, %v688_v47  ;;  %v701_v3 = vrot.slane %v698_v56, 4  ;;  %v677_v6 = vsel %vm2190_vm1, %v672_v5, %v676_v59  ;;  %v654_v10 = vmax.f32 %v1781_v8, %v652_v1  ;;  %vm2193_vm2 = vmmov %vm2190_vm1 }
 0x138   : > { %v697_v12 = vsel %vm1852_vm14, %v690_v2, -inf  ;;  %v2195_v16 = vsel %vm1871_vm5, 4294967295, %v2194_v16 }
 0x139   : > { %v702_v15 = vsel %vm2193_vm2, %v697_v12, %v701_v3  ;;  %v679_v19 = vmax.f32 %v654_v10, %v677_v6  ;;  %vm2196_vm2 = vcmp.lt.s32.totalorder %v1693_v13, 2 }
 0x13b   : > { %v704_v21 = vmax.f32 %v679_v19, %v702_v15 }
 0x13c   : > { %v713_v14 = vpop.permute.xlu0 %712 }
 0x13d   : > { %v715_v17 = vsel %vm2154_vm3, %v711_v11, %v713_v14  ;;  %v716_v18 = vsel %vm2154_vm3, %v713_v14, %v711_v11  ;;  %vm2198_vm3 = vmmov %vm2196_vm2 }
 0x13e   : > { %v723_v8 = vsel %vm1863_vm7, %v716_v18, -inf  ;;  %v722_v23 = vsel %vm1871_vm5, %v715_v17, -inf  ;;  %vm2199_vm5 = vcmp.lt.s32.totalorder %v1693_v13, 127 }
 0x13f   : > { %v726_v20 = vrot.slane %v723_v8, 4 }
 0x141   : > { %v727_v24 = vsel %vm2190_vm1, %v722_v23, %v726_v20  ;;  %vm2197_vm1 = vcmp.lt.s32.totalorder %v1693_v13, 1 }
 0x142   : > { %v1884_v25 = vmax.f32 %v704_v21, %v727_v24 }
 0x144   : > { %731 = vst [vmem:[#allocation1] ss:$2 sm:$0xff] %v1884_v25 }
 0x14b   : > { %v733_v26 = vld.sshfl [vmem:[#allocation1 + $0x8] sm:$0xff pattern:$0x75316420]  ;;  %v732_v27 = vld.sshfl [vmem:[#allocation1] sm:$0xff pattern:$0x75316420] }
 0x14c   : > { %738 = vrot.lane.b32.xlu2 %v733_v26, %s1596_s13  ;;  %736 = vrot.lane.b32.xlu1 %v732_v27, %s1596_s13  ;;  %750 = vst [vmem:[#allocation1] ss:$2 sm:$0xff] %v1884_v25 }
 0x153   : > { %v752_v28 = vld.sshfl [vmem:[#allocation1 + $0x8] sm:$0xff pattern:$0x75316420]  ;;  %v751_v29 = vld.sshfl [vmem:[#allocation1] sm:$0xff pattern:$0x75316420] }
 0x154   : > { %757 = vrot.lane.b32.xlu1 %v752_v28, %s1597_s14  ;;  %755 = vrot.lane.b32.xlu0 %v751_v29, %s1597_s14  ;;  %769 = vst [vmem:[#allocation1] ss:$2 sm:$0xff] %v1884_v25 }
 0x15b   : > { %v771_v30 = vld.sshfl [vmem:[#allocation1 + $0x8] sm:$0xff pattern:$0x75316420]  ;;  %v770_v31 = vld.sshfl [vmem:[#allocation1] sm:$0xff pattern:$0x75316420] }
 0x15c   : > { %776 = vrot.lane.b32.xlu0 %v771_v30, %s1598_s15  ;;  %774 = vrot.lane.b32.xlu2 %v770_v31, %s1598_s15  ;;  %788 = vst [vmem:[#allocation1] ss:$2 sm:$0xff] %v1884_v25 }
 0x163   : > { %v790_v34 = vld.sshfl [vmem:[#allocation1 + $0x8] sm:$0xff pattern:$0x75316420]  ;;  %v789_v36 = vld.sshfl [vmem:[#allocation1] sm:$0xff pattern:$0x75316420] }
 0x164   : > { %795 = vrot.lane.b32.xlu2 %v790_v34, %s1599_s16  ;;  %793 = vrot.lane.b32.xlu1 %v789_v36, %s1599_s16 }
 0x1a6   : > { %v739_v39 = vpop.permute.xlu2 %738 }
 0x1b6   : > { %v775_v47 = vpop.permute.xlu2 %774 }
 0x1be   : > { %v737_v38 = vpop.permute.xlu1 %736  ;;  %v796_v6 = vpop.permute.xlu2 %795 }
 0x1bf   : > { %v740_v44 = vsel %vm2196_vm2, %v737_v38, %v739_v39  ;;  %v741_v53 = vsel %vm2198_vm3, %v739_v39, %v737_v38  ;;  %vm2200_vm2 = vmmov %vm2197_vm1 }
 0x1c0   : > { %v743_v48 = vsel %vm1704_vm4, %v740_v44, -inf  ;;  %v742_v60 = vsel %vm1718_vm8, %v741_v53, -inf }
 0x1c1   : > { %v746_v54 = vrot.slane %v743_v48, 4 }
 0x1c6   : > { %v756_v42 = vpop.permute.xlu0 %755  ;;  %v758_v43 = vpop.permute.xlu1 %757 }
 0x1c7   : > { %v759_v46 = vsel %vm2197_vm1, %v756_v42, %v758_v43  ;;  %v760_v9 = vsel %vm2200_vm2, %v758_v43, %v756_v42  ;;  %vm2201_vm1 = vcmask 1043456   ;;  %vm2205_vm2 = vcmp.lt.s32.totalorder %v1693_v13, 126 }
 0x1c8   : > { %v762_v49 = vsel %vm1724_vm9, %v759_v46, -inf  ;;  %v747_v61 = vsel %vm2201_vm1, %v742_v60, %v746_v54  ;;  %vm2202_vm9 = vmmov %vm2199_vm5  ;;  %v761_v3 = vsel %vm1735_vm12, %v760_v9, -inf }
 0x1c9   : > { %v765_v59 = vrot.slane %v762_v49, 4  ;;  %vm2203_vm3 = vmmov %vm2201_vm1  ;;  %v749_v5 = vmax.f32 %v1884_v25, %v747_v61 }
 0x1cb   : > { %v766_v4 = vsel %vm2203_vm3, %v761_v3, %v765_v59  ;;  %vm2207_vm3 = vcmp.lt.s32.totalorder %v1693_v13, 32 }
 0x1cc   : > { %v768_v17 = vmax.f32 %v749_v5, %v766_v4 }
 0x1ce   : > { %v777_v50 = vpop.permute.xlu0 %776 }
 0x1cf   : > { %v779_v55 = vsel %vm2199_vm5, %v777_v50, %v775_v47  ;;  %v778_v1 = vsel %vm2202_vm9, %v775_v47, %v777_v50  ;;  %vm2204_vm5 = vmmov %vm2201_vm1 }
 0x1d0   : > { %v781_v56 = vsel %vm1728_vm11, %v779_v55, -inf  ;;  %v780_v10 = vsel %vm1752_vm13, %v778_v1, -inf  ;;  %vm2206_vm9 = vmmov %vm2205_vm2 }
 0x1d1   : > { %v784_v2 = vrot.slane %v781_v56, 4 }
 0x1d3   : > { %v785_v12 = vsel %vm2204_vm5, %v780_v10, %v784_v2  ;;  %vm2208_vm5 = vcmp.lt.s32.totalorder %v1693_v13, 16 }
 0x1d4   : > { %v787_v8 = vmax.f32 %v768_v17, %v785_v12 }
 0x1d6   : > { %v794_v11 = vpop.permute.xlu1 %793 }
 0x1d7   : > { %v797_v14 = vsel %vm2205_vm2, %v794_v11, %v796_v6  ;;  %v798_v15 = vsel %vm2206_vm9, %v796_v6, %v794_v11  ;;  %vm2209_vm2 = vnez %v2176_v33  ;;  %vm2210_vm9 = vnez %v2178_v40 }
 0x1d8   : > { %v800_v18 = vsel %vm1761_vm15, %v798_v15, -inf  ;;  %v799_v20 = vsel %vm1767_vm0, %v797_v14, -inf  ;;  %vm2212_vm0 = vcmp.lt.s32.totalorder %v1693_v13, 112 }
 0x1d9   : > { %v803_v19 = vrot.slane %v800_v18, 4 }
 0x1db   : > { %v804_v21 = vsel %vm2201_vm1, %v799_v20, %v803_v19  ;;  %vm2211_vm1 = vmmov %vm2207_vm3 }
 0x1dc   : > { %v806_v23 = vmax.f32 %v787_v8, %v804_v21 }
 0x1de   : > { %808 = vst [vmem:[#allocation1] ss:$2 sm:$0xff] %v806_v23 }
 0x1e5   : > { %v810_v24 = vld.sshfl [vmem:[#allocation1 + $0x8] sm:$0xff pattern:$0x75316420]  ;;  %v809_v26 = vld.sshfl [vmem:[#allocation1] sm:$0xff pattern:$0x75316420] }
 0x1e6   : > { %815 = vrot.lane.b32.xlu1 %v810_v24, %s1601_s25  ;;  %813 = vrot.lane.b32.xlu0 %v809_v26, %s1601_s25  ;;  %827 = vst [vmem:[#allocation1] ss:$2 sm:$0xff] %v806_v23 }
 0x1ed   : > { %v829_v27 = vld.sshfl [vmem:[#allocation1 + $0x8] sm:$0xff pattern:$0x75316420]  ;;  %v828_v28 = vld.sshfl [vmem:[#allocation1] sm:$0xff pattern:$0x75316420] }
 0x1ee   : > { %834 = vrot.lane.b32.xlu0 %v829_v27, %s1602_s26  ;;  %832 = vrot.lane.b32.xlu2 %v828_v28, %s1602_s26  ;;  %846 = vst [vmem:[#allocation1] ss:$2 sm:$0xff] %v806_v23 }
 0x1f5   : > { %v848_v29 = vld.sshfl [vmem:[#allocation1 + $0x8] sm:$0xff pattern:$0x75316420]  ;;  %v847_v30 = vld.sshfl [vmem:[#allocation1] sm:$0xff pattern:$0x75316420] }
 0x1f6   : > { %853 = vrot.lane.b32.xlu2 %v848_v29, %s1603_s9  ;;  %851 = vrot.lane.b32.xlu1 %v847_v30, %s1603_s9  ;;  %865 = vst [vmem:[#allocation1] ss:$2 sm:$0xff] %v806_v23 }
 0x1fd   : > { %v867_v31 = vld.sshfl [vmem:[#allocation1 + $0x8] sm:$0xff pattern:$0x75316420]  ;;  %v866_v34 = vld.sshfl [vmem:[#allocation1] sm:$0xff pattern:$0x75316420] }
 0x1fe   : > { %872 = vrot.lane.b32.xlu1 %v867_v31, %s1604_s10  ;;  %870 = vrot.lane.b32.xlu0 %v866_v34, %s1604_s10 }
 0x248   : > { %v833_v38 = vpop.permute.xlu2 %832 }
 0x250   : > { %v854_v47 = vpop.permute.xlu2 %853 }
 0x258   : > { %v814_v36 = vpop.permute.xlu0 %813  ;;  %v816_v39 = vpop.permute.xlu1 %815 }
 0x259   : > { %v817_v43 = vsel %vm2207_vm3, %v814_v36, %v816_v39  ;;  %v818_v50 = vsel %vm2211_vm1, %v816_v39, %v814_v36  ;;  %vm2213_vm3 = vnez %v2180_v45 }
 0x25a   : > { %v820_v46 = vsel %vm2209_vm2, %v817_v43, -inf  ;;  %v819_v59 = vsel %vm1834_vm10, %v818_v50, -inf  ;;  %vm2214_vm2 = vcmask 1043456  }
 0x25b   : > { %v823_v53 = vrot.slane %v820_v46, 4 }
 0x25d   : > { %v824_v60 = vsel %vm2214_vm2, %v819_v59, %v823_v53 }
 0x25e   : > { %v826_v4 = vmax.f32 %v806_v23, %v824_v60 }
 0x260   : > { %v835_v42 = vpop.permute.xlu0 %834 }
 0x261   : > { %v836_v44 = vsel %vm2208_vm5, %v833_v38, %v835_v42  ;;  %v837_v56 = vsel %vm2208_vm5, %v835_v42, %v833_v38  ;;  %vm2218_vm5 = vcmp.lt.s32.totalorder %v1693_v13, 96 }
 0x262   : > { %v839_v48 = vsel %vm2210_vm9, %v836_v44, -inf  ;;  %vm2215_vm9 = vmmov %vm2212_vm0  ;;  %v838_v2 = vsel %vm1844_vm6, %v837_v56, -inf }
 0x263   : > { %v842_v9 = vrot.slane %v839_v48, 4 }
 0x268   : > { %v852_v49 = vpop.permute.xlu1 %851 }
 0x269   : > { %v856_v54 = vsel %vm2212_vm0, %v854_v47, %v852_v49  ;;  %v855_v61 = vsel %vm2215_vm9, %v852_v49, %v854_v47  ;;  %vm2216_vm0 = vmmov %vm2214_vm2  ;;  %vm2220_vm9 = vnez %v2195_v16 }
 0x26a   : > { %v858_v55 = vsel %vm2213_vm3, %v856_v54, -inf  ;;  %v843_v3 = vsel %vm2216_vm0, %v838_v2, %v842_v9  ;;  %v857_v5 = vsel %vm1852_vm14, %v855_v61, -inf  ;;  %vm2217_vm1 = vmmov %vm2216_vm0 }
 0x26b   : > { %v861_v1 = vrot.slane %v858_v55, 4  ;;  %vm2219_vm2 = vmmov %vm2218_vm5  ;;  %v845_v15 = vmax.f32 %v826_v4, %v843_v3 }
 0x26d   : > { %v862_v11 = vsel %vm2217_vm1, %v857_v5, %v861_v1  ;;  %vm2221_vm1 = vcmp.lt.s32.totalorder %v1693_v13, 2 }
 0x26e   : > { %v864_v19 = vmax.f32 %v845_v15, %v862_v11 }
 0x270   : > { %v873_v6 = vpop.permute.xlu1 %872  ;;  %v871_v10 = vpop.permute.xlu0 %870 }
 0x271   : > { %v874_v12 = vsel %vm2218_vm5, %v871_v10, %v873_v6  ;;  %v875_v14 = vsel %vm2219_vm2, %v873_v6, %v871_v10  ;;  %vm2222_vm5 = vcmp.lt.s32.totalorder %v1693_v13, 1  ;;  %vm2223_vm2 = vnez %v2164_v35 }
 0x272   : > { %v877_v17 = vsel %vm1863_vm7, %v875_v14, -inf  ;;  %v876_v8 = vsel %vm2220_vm9, %v874_v12, -inf  ;;  %vm2225_vm9 = vcmp.lt.s32.totalorder %v1693_v13, 127 }
 0x273   : > { %v880_v18 = vrot.slane %v877_v17, 4 }
 0x275   : > { %v881_v20 = vsel %vm2216_vm0, %v876_v8, %v880_v18  ;;  %vm2224_vm0 = vmmov %vm2221_vm1 }
 0x276   : > { %v1979_v21 = vmax.f32 %v864_v19, %v881_v20 }
 0x278   : > { %885 = vst [vmem:[#allocation1] ss:$2 sm:$0xff] %v1979_v21 }
 0x27f   : > { %v887_v23 = vld.sshfl [vmem:[#allocation1 + $0x8] sm:$0xff pattern:$0x75316420]  ;;  %v886_v24 = vld.sshfl [vmem:[#allocation1] sm:$0xff pattern:$0x75316420] }
 0x280   : > { %892 = vrot.lane.b32.xlu0 %v887_v23, %s1596_s13  ;;  %890 = vrot.lane.b32.xlu2 %v886_v24, %s1596_s13  ;;  %904 = vst [vmem:[#allocation1] ss:$2 sm:$0xff] %v1979_v21 }
 0x287   : > { %v906_v26 = vld.sshfl [vmem:[#allocation1 + $0x8] sm:$0xff pattern:$0x75316420]  ;;  %v905_v27 = vld.sshfl [vmem:[#allocation1] sm:$0xff pattern:$0x75316420] }
 0x288   : > { %911 = vrot.lane.b32.xlu2 %v906_v26, %s1597_s14  ;;  %909 = vrot.lane.b32.xlu1 %v905_v27, %s1597_s14  ;;  %923 = vst [vmem:[#allocation1] ss:$2 sm:$0xff] %v1979_v21 }
 0x28f   : > { %v925_v28 = vld.sshfl [vmem:[#allocation1 + $0x8] sm:$0xff pattern:$0x75316420]  ;;  %v924_v29 = vld.sshfl [vmem:[#allocation1] sm:$0xff pattern:$0x75316420] }
 0x290   : > { %930 = vrot.lane.b32.xlu1 %v925_v28, %s1598_s15  ;;  %928 = vrot.lane.b32.xlu0 %v924_v29, %s1598_s15  ;;  %942 = vst [vmem:[#allocation1] ss:$2 sm:$0xff] %v1979_v21 }
 0x297   : > { %v944_v30 = vld.sshfl [vmem:[#allocation1 + $0x8] sm:$0xff pattern:$0x75316420]  ;;  %v943_v31 = vld.sshfl [vmem:[#allocation1] sm:$0xff pattern:$0x75316420] }
 0x298   : > { %949 = vrot.lane.b32.xlu0 %v944_v30, %s1599_s16  ;;  %947 = vrot.lane.b32.xlu2 %v943_v31, %s1599_s16  ;;  %v1141_v31 = vld [vmem:[%s2135_s4] sm:$0xff] }
 0x2da   : > { %v891_v34 = vpop.permute.xlu2 %890 }
 0x2e2   : > { %v912_v42 = vpop.permute.xlu2 %911 }
 0x2f2   : > { %v893_v36 = vpop.permute.xlu0 %892  ;;  %v948_v1 = vpop.permute.xlu2 %947 }
 0x2f3   : > { %v894_v39 = vsel %vm2221_vm1, %v891_v34, %v893_v36  ;;  %v895_v49 = vsel %vm2224_vm0, %v893_v36, %v891_v34  ;;  %vm2226_vm1 = vmmov %vm2222_vm5  ;;  %v1259_v36 = vld [vmem:[%s2137_s6] sm:$0xff] }
 0x2f4   : > { %v897_v44 = vsel %vm1704_vm4, %v894_v39, -inf  ;;  %v896_v35 = vsel %vm1718_vm8, %v895_v49, -inf  ;;  %vm2227_vm4 = vcmask 1043456   ;;  %vm2231_vm8 = vcmp.lt.s32.totalorder %v1693_v13, 126 }
 0x2f5   : > { %v900_v50 = vrot.slane %v897_v44, 4  ;;  %vm2234_vm0 = vmmov %vm2227_vm4 }
 0x2f7   : > { %v901_v56 = vsel %vm2227_vm4, %v896_v35, %v900_v50 }
 0x2f8   : > { %v903_v37 = vmax.f32 %v1979_v21, %v901_v56 }
 0x2fa   : > { %v910_v38 = vpop.permute.xlu1 %909 }
 0x2fb   : > { %v913_v43 = vsel %vm2222_vm5, %v910_v38, %v912_v42  ;;  %v914_v55 = vsel %vm2226_vm1, %v912_v42, %v910_v38  ;;  %vm2228_vm5 = vmmov %vm2225_vm9  ;;  %v1267_v38 = vld [vmem:[%s2138_s7] sm:$0xff] }
 0x2fc   : > { %v916_v46 = vsel %vm2223_vm2, %v913_v43, -inf  ;;  %v915_v60 = vsel %vm1735_vm12, %v914_v55, -inf  ;;  %vm2232_vm2 = vmmov %vm2231_vm8  ;;  %vm2233_vm12 = vnez %v2174_v62 }
 0x2fd   : > { %v919_v22 = vrot.slane %v916_v46, 4  ;;  %vm2237_vm1 = vmmov %vm2234_vm0 }
 0x302   : > { %v931_v47 = vpop.permute.xlu1 %930  ;;  %v929_v48 = vpop.permute.xlu0 %928 }
 0x303   : > { %v933_v53 = vsel %vm2225_vm9, %v931_v47, %v929_v48  ;;  %v932_v9 = vsel %vm2228_vm5, %v929_v48, %v931_v47  ;;  %vm2229_vm9 = vmmov %vm2227_vm4 }
 0x304   : > { %v935_v54 = vsel %vm1728_vm11, %v933_v53, -inf  ;;  %v920_v61 = vsel %vm2229_vm9, %v915_v60, %v919_v22  ;;  %v934_v2 = vsel %vm1752_vm13, %v932_v9, -inf  ;;  %vm2230_vm11 = vmmov %vm2227_vm4 }
 0x305   : > { %v938_v59 = vrot.slane %v935_v54, 4  ;;  %v922_v6 = vmax.f32 %v903_v37, %v920_v61  ;;  %vm2235_vm13 = vmmov %vm2234_vm0 }
 0x306   : > { %vm2238_vm4 = vmmov %vm2234_vm0 }
 0x307   : > { %v939_v32 = vsel %vm2230_vm11, %v934_v2, %v938_v59  ;;  %vm2239_vm5 = vmmov %vm2234_vm0  ;;  %vm1043_vm11 = vcmask 31744  }
 0x308   : > { %v941_v11 = vmax.f32 %v922_v6, %v939_v32  ;;  %vm2240_vm9 = vmmov %vm2234_vm0 }
 0x30a   : > { %v950_v3 = vpop.permute.xlu0 %949 }
 0x30b   : > { %v951_v4 = vsel %vm2231_vm8, %v948_v1, %v950_v3  ;;  %v952_v5 = vsel %vm2232_vm2, %v950_v3, %v948_v1  ;;  %vm2241_vm8 = vcmp.lt.s32.totalorder %v1693_v13, 32  ;;  %vm2242_vm2 = vcmp.lt.s32.totalorder %v1693_v13, 16 }
 0x30c   : > { %v954_v41 = vsel %vm1761_vm15, %v952_v5, -inf  ;;  %v953_v12 = vsel %vm2233_vm12, %v951_v4, -inf  ;;  %vm2236_vm15 = vmmov %vm2234_vm0  ;;  %vm2243_vm12 = vnez %v2176_v33 }
 0x30d   : > { %v957_v10 = vrot.slane %v954_v41, 4  ;;  %v1194_v41 = vld [vmem:[%s2136_s5] sm:$0xff] }
 0x30f   : > { %v958_v51 = vsel %vm2234_vm0, %v953_v12, %v957_v10  ;;  %vm2244_vm0 = vnez %v2178_v40 }
 0x310   : > { %v2030_v14 = vmax.f32 %v941_v11, %v958_v51 }
 0x312   : > { %962 = vst [vmem:[#allocation1] ss:$2 sm:$0xff] %v2030_v14 }
 0x319   : > { %v964_v15 = vld.sshfl [vmem:[#allocation1 + $0x8] sm:$0xff pattern:$0x75316420]  ;;  %v963_v17 = vld.sshfl [vmem:[#allocation1] sm:$0xff pattern:$0x75316420] }
 0x31a   : > { %969 = vrot.lane.b32.xlu2 %v964_v15, %s1601_s25  ;;  %967 = vrot.lane.b32.xlu1 %v963_v17, %s1601_s25  ;;  %981 = vst [vmem:[#allocation1] ss:$2 sm:$0xff] %v2030_v14 }
 0x321   : > { %v983_v57 = vld.sshfl [vmem:[#allocation1 + $0x8] sm:$0xff pattern:$0x75316420]  ;;  %v982_v18 = vld.sshfl [vmem:[#allocation1] sm:$0xff pattern:$0x75316420] }
 0x322   : > { %988 = vrot.lane.b32.xlu1 %v983_v57, %s1602_s26  ;;  %986 = vrot.lane.b32.xlu0 %v982_v18, %s1602_s26  ;;  %1000 = vst [vmem:[#allocation1] ss:$2 sm:$0xff] %v2030_v14 }
 0x329   : > { %v1002_v62 = vld.sshfl [vmem:[#allocation1 + $0x8] sm:$0xff pattern:$0x75316420]  ;;  %v1001_v19 = vld.sshfl [vmem:[#allocation1] sm:$0xff pattern:$0x75316420] }
 0x32a   : > { %1007 = vrot.lane.b32.xlu0 %v1002_v62, %s1603_s9  ;;  %1005 = vrot.lane.b32.xlu2 %v1001_v19, %s1603_s9  ;;  %1019 = vst [vmem:[#allocation1] ss:$2 sm:$0xff] %v2030_v14 }
 0x331   : > { %v1021_v8 = vld.sshfl [vmem:[#allocation1 + $0x8] sm:$0xff pattern:$0x75316420]  ;;  %v1020_v20 = vld.sshfl [vmem:[#allocation1] sm:$0xff pattern:$0x75316420] }
 0x332   : > { %1026 = vrot.lane.b32.xlu2 %v1021_v8, %s1604_s10  ;;  %1024 = vrot.lane.b32.xlu1 %v1020_v20, %s1604_s10  ;;  %1040 = vst [vmem:[#allocation1] ss:$2 sm:$0xff] %v1884_v25  ;;  %v1038_v25 = vld [vmem:[%s2133_s2] sm:$0xff] }
 0x333   : > { %1262 = vperm.xlu0 %1562, %v1259_v36  }
 0x339   : > { %v1041_v23 = vld.sshfl [vmem:[#allocation1] sm:$0xff pattern:$0x75316420]  ;;  %v1042_v24 = vld.sshfl [vmem:[#allocation1 + $0x8] sm:$0xff pattern:$0x75316420] }
 0x33a   : > { %1509 = vmatpush.msk.msra.mxu0 %vm2235_vm13, %v1041_v23  ;;  %1511 = vmatpush.msk.msra.mxu1 %vm2236_vm15, %v1042_v24  ;;  %1091 = vst [vmem:[#allocation1] ss:$2 sm:$0xff] %v1674_v0  ;;  %v1039_v0 = vld [vmem:[%s2134_s3] sm:$0xff]  ;;  %vm2245_vm13 = vmmov %vm2241_vm8  ;;  %vm2246_vm15 = vcmp.lt.s32.totalorder %v1693_v13, 112 }
 0x33b   : > { %1510 = vmatmul.msk.f32.vlgmr.msra.gmra.mxu0 %vm1043_vm11, %v1039_v0  ;;  %1512 = vmatmul.msk.f32.vlgmr.msra.gmra.mxu1 %vm1043_vm11, %v1039_v0 }
 0x33c   : > { %1270 = vperm.xlu1 %1563, %v1267_v38  }
 0x341   : > { %v1092_v26 = vld.sshfl [vmem:[#allocation1] sm:$0xff pattern:$0x75316420]  ;;  %v1093_v27 = vld.sshfl [vmem:[#allocation1 + $0x8] sm:$0xff pattern:$0x75316420] }
 0x342   : > { %1142 = vst [vmem:[#allocation1] ss:$2 sm:$0xff] %v1979_v21  ;;  %1513 = vmatpush.msk.msra.mxu2 %vm2237_vm1, %v1092_v26  ;;  %1515 = vmatpush.msk.msra.mxu3 %vm2238_vm4, %v1093_v27  ;;  %vm2247_vm1 = vmmov %vm2242_vm2 }
 0x343   : > { %1514 = vmatmul.msk.f32.vlgmr.msra.gmra.mxu2 %vm1043_vm11, %v1038_v25  ;;  %1516 = vmatmul.msk.f32.vlgmr.msra.gmra.mxu3 %vm1043_vm11, %v1038_v25 }
 0x349   : > { %v1143_v28 = vld.sshfl [vmem:[#allocation1] sm:$0xff pattern:$0x75316420]  ;;  %v1144_v29 = vld.sshfl [vmem:[#allocation1 + $0x8] sm:$0xff pattern:$0x75316420] }
 0x34a   : > { %1517 = vmatpush.msk.msrb.mxu0 %vm2239_vm5, %v1143_v28  ;;  %1519 = vmatpush.msk.msrb.mxu1 %vm2240_vm9, %v1144_v29  ;;  %vm2248_vm5 = vmmov %vm2246_vm15 }
 0x34b   : > { %1518 = vmatmul.msk.f32.vlgmr.msrb.gmra.mxu0 %vm1043_vm11, %v1141_v31  ;;  %1520 = vmatmul.msk.f32.vlgmr.msrb.gmra.mxu1 %vm1043_vm11, %v1141_v31  ;;  %vm2249_vm9 = vmmov %vm2238_vm4 }
 0x374   : > { %v970_v30 = vpop.permute.xlu2 %969 }
 0x384   : > { %v1006_v44 = vpop.permute.xlu2 %1005 }
 0x38c   : > { %v968_v21 = vpop.permute.xlu1 %967  ;;  %v1027_v60 = vpop.permute.xlu2 %1026 }
 0x38d   : > { %v971_v42 = vsel %vm2241_vm8, %v968_v21, %v970_v30  ;;  %v972_v49 = vsel %vm2245_vm13, %v970_v30, %v968_v21 }
 0x38e   : > { %v974_v46 = vsel %vm2243_vm12, %v971_v42, -inf  ;;  %v973_v33 = vsel %vm1834_vm10, %v972_v49, -inf  ;;  %vm2251_vm10 = vcmp.lt.s32.totalorder %v1693_v13, 96 }
 0x38f   : > { %v977_v50 = vrot.slane %v974_v46, 4  ;;  %vm2252_vm8 = vmmov %vm2251_vm10 }
 0x391   : > { %v978_v40 = vsel %vm2238_vm4, %v973_v33, %v977_v50 }
 0x392   : > { %v980_v45 = vmax.f32 %v2030_v14, %v978_v40 }
 0x394   : > { %v987_v34 = vpop.permute.xlu0 %986  ;;  %v989_v39 = vpop.permute.xlu1 %988 }
 0x395   : > { %v990_v43 = vsel %vm2242_vm2, %v987_v34, %v989_v39  ;;  %v991_v55 = vsel %vm2247_vm1, %v989_v39, %v987_v34 }
 0x396   : > { %v993_v47 = vsel %vm2244_vm0, %v990_v43, -inf  ;;  %v992_v9 = vsel %vm1844_vm6, %v991_v55, -inf  ;;  %vm2253_vm6 = vnez %v2195_v16 }
 0x397   : > { %v996_v22 = vrot.slane %v993_v47, 4 }
 0x399   : > { %v997_v59 = vsel %vm2249_vm9, %v992_v9, %v996_v22 }
 0x39a   : > { %v999_v3 = vmax.f32 %v980_v45, %v997_v59 }
 0x39c   : > { %v1008_v48 = vpop.permute.xlu0 %1007 }
 0x39d   : > { %v1010_v53 = vsel %vm2246_vm15, %v1008_v48, %v1006_v44  ;;  %v1009_v35 = vsel %vm2248_vm5, %v1006_v44, %v1008_v48 }
 0x39e   : > { %v1012_v54 = vsel %vm2213_vm3, %v1010_v53, -inf  ;;  %v1011_v61 = vsel %vm1852_vm14, %v1009_v35, -inf  ;;  %vm2250_vm3 = vmmov %vm2238_vm4 }
 0x39f   : > { %v1015_v56 = vrot.slane %v1012_v54, 4  ;;  %vm2254_vm2 = vmmov %vm2250_vm3 }
 0x3a0   : > { %vm2255_vm14 = vmmov %vm2254_vm2 }
 0x3a1   : > { %v1016_v52 = vsel %vm2250_vm3, %v1011_v61, %v1015_v56  ;;  %vm2256_vm12 = vmmov %vm2254_vm2 }
 0x3a2   : > { %v1018_v4 = vmax.f32 %v999_v3, %v1016_v52 }
 0x3a4   : > { %v1025_v37 = vpop.permute.xlu1 %1024 }
 0x3a5   : > { %v1028_v1 = vsel %vm2251_vm10, %v1025_v37, %v1027_v60  ;;  %v1029_v2 = vsel %vm2252_vm8, %v1027_v60, %v1025_v37  ;;  %v1263_v62 = vpop.permute.xlu0 %1262 }
 0x3a6   : > { %v1031_v58 = vsel %vm1863_vm7, %v1029_v2, -inf  ;;  %v1030_v5 = vsel %vm2253_vm6, %v1028_v1, -inf }
 0x3a7   : > { %v1034_v32 = vrot.slane %v1031_v58, 4 }
 0x3a9   : > { %v1035_v63 = vsel %vm2254_vm2, %v1030_v5, %v1034_v32 }
 0x3aa   : > { %v1037_v6 = vmax.f32 %v1018_v4, %v1035_v63 }
 0x3ac   : > { %1196 = vst [vmem:[#allocation1] ss:$2 sm:$0xff] %v1037_v6 }
 0x3ae   : > { %v1271_v24 = vpop.permute.xlu1 %1270 }
 0x3b3   : > { %v1197_v10 = vld.sshfl [vmem:[#allocation1] sm:$0xff pattern:$0x75316420]  ;;  %v1198_v13 = vld.sshfl [vmem:[#allocation1 + $0x8] sm:$0xff pattern:$0x75316420] }
 0x3b4   : > { %1521 = vmatpush.msk.msrb.mxu2 %vm2255_vm14, %v1197_v10  ;;  %1523 = vmatpush.msk.msrb.mxu3 %vm2256_vm12, %v1198_v13 }
 0x3b5   : > { %1522 = vmatmul.msk.f32.vlgmr.msrb.gmra.mxu2 %vm1043_vm11, %v1194_v41  ;;  %1524 = vmatmul.msk.f32.vlgmr.msrb.gmra.mxu3 %vm1043_vm11, %v1194_v41 }
 0x3b8   : > { %v1068_v7 = vpop.f32.mrf.mxu0  ;;  %v1088_v16 = vpop.f32.mrf.mxu1 }
 0x3c6   : > { %v1118_v11 = vpop.f32.mrf.mxu2  ;;  %v1138_v12 = vpop.f32.mrf.mxu3 }
 0x3c7   : > { %v1119_v51 = vadd.f32 %v1118_v11, %v1068_v7  ;;  %v1139_v14 = vadd.f32 %v1138_v12, %v1088_v16 }
 0x3c8   : > { %v1169_v15 = vpop.f32.mrf.mxu0  ;;  %v1189_v17 = vpop.f32.mrf.mxu1 }
 0x3c9   : > { %v1192_v57 = vadd.f32 %v1169_v15, %v1119_v51  ;;  %v1193_v18 = vadd.f32 %v1189_v17, %v1139_v14 }
 0x438   : > { %v1223_v19 = vpop.f32.mrf.mxu2  ;;  %v1243_v8 = vpop.f32.mrf.mxu3 }
 0x439   : > { %v1246_v20 = vadd.f32 %v1223_v19, %v1192_v57  ;;  %v1247_v23 = vadd.f32 %v1243_v8, %v1193_v18 }
 0x43b   : > { %v1265_v26 = vmul.f32 %v1263_v62, %v1246_v20  ;;  %v1266_v27 = vmul.f32 %v1263_v62, %v1247_v23 }
 0x43d   : > { %v1273_v28 = vadd.f32 %v1271_v24, %v1265_v26  ;;  %v1274_v29 = vadd.f32 %v1271_v24, %v1266_v27 }
 0x43f   : > { %v1275_v25 = vsub.f32 0.0, %v1273_v28  ;;  %v1276_v0 = vsub.f32 0.0, %v1274_v29 }
 0x441   : > { %v1277_v21 = vmul.f32 1.442695, %v1275_v25  ;;  %v1279_v30 = vmul.f32 1.442695, %v1276_v0 }
 0x443   : > { %1564 = vpow2.f32 %v1277_v21 }
 0x444   : > { %1566 = vpow2.f32 %v1279_v30 }
 0x449   : > { %v1565_v31 = vpop.eup %1564 }
 0x44a   : > { %v1567_v34 = vpop.eup %1566  ;;  %v1281_v36 = vadd.f32 1.0, %v1565_v31 }
 0x44b   : > { %v1282_v38 = vadd.f32 1.0, %v1567_v34 }
 0x44c   : > { %1568 = vrcp.f32 %v1281_v36 }
 0x44d   : > { %1570 = vrcp.f32 %v1282_v38 }
 0x452   : > { %v1569_v39 = vpop.eup %1568 }
 0x453   : > { %v1571_v42 = vpop.eup %1570  ;;  %v1285_v43 = vmul.f32 %v1569_v39, %v1273_v28 }
 0x454   : > { %v1286_v44 = vmul.f32 %v1571_v42, %v1274_v29 }
 0x455   : > { %1287 = vst [vmem:[%s494_s20] sm:$0xff] %v1285_v43 }
 0x456   : > { %1288 = vst [vmem:[%s494_s20 + $0x8] sm:$0xff] %v1286_v44 }
 0x457 PF: > { %s18_s29 = sadd.s32 1, %s1594_s29   ;;  %s2257_s27 = smov %s1590_s28 }
 0x458   : > { %p15_p5 = scmp.ge.s32.totalorder %s18_s29, 4   ;;  %s2258_s28 = smov %s2260_s30 }
 0x45a   :  { %17 = sbr.rel (!%p15_p5) target bundleno = 2 (0x2), region = 115 }

</bundles_post_ra>
